<compile_context>
chip_gen: v7x
topology: tpu7x:2x2x1
jax: 0.10.0
libtpu: 0.0.40
codegen_flags: <defaults>
</compile_context>

<pallas_src>
import jax
import jax.numpy as jnp
from jax import lax
from jax.experimental import pallas as pl
from jax.experimental.pallas import tpu as pltpu

GROUPS = 32
EPS = 1e-6


def _pick_tile(total, desired):
    """Largest multiple of 128 that divides `total` and is <= desired, else the full extent."""
    d = min(desired, total)
    d -= d % 128
    while d >= 128:
        if total % d == 0:
            return d
        d -= 128
    # TODO(synk): for non-128-multiple spatial sizes (e.g. 30x30) consider padding HW
    # instead of falling back to a single full-extent tile.
    return total


def _vmem_limit_bytes():
    # Per-generation VMEM budget: ~75% of per-core capacity (48 MiB on v7x, 96 MiB on
    # v5e/v6e), capped at 100 MiB so double-buffered BlockSpecs keep headroom.
    cap = 128 * 1024 * 1024
    try:
        cap = int(getattr(pltpu.get_tpu_info(), "vmem_capacity_bytes", cap))
    except Exception:
        pass
    return min((cap * 3) // 4, 100 * 1024 * 1024)


def attn_block_pallas(x_nchw, params, *, tq=256, tk=256, thw=256):
    b, c, h, w = x_nchw.shape
    hw = h * w
    g = GROUPS
    assert c % g == 0, "GroupNorm(32, C) requires C % 32 == 0"

    tq = _pick_tile(hw, tq)
    tk = _pick_tile(hw, tk)
    thw = _pick_tile(hw, thw)
    nt, nq, nk = hw // thw, hw // tq, hw // tk

    f32, bf = jnp.float32, jnp.bfloat16
    inv_n = 1.0 / float(hw * (c // g))
    q_scale = float(c) ** (-0.5)
    vmem_limit = _vmem_limit_bytes()

    # x stays in (B, C, HW) layout (flattened NCHW): the (HW,C) <-> (C,HW) layout changes
    # are folded into the kernels, eliminating both wrapper-side HBM transposes.
    x_seq = x_nchw.reshape(b, c, hw).astype(f32)

    # one-hot group membership: member[ch, grp] = 1 iff channel ch belongs to group grp
    member = (jnp.arange(c)[:, None] // (c // g) == jnp.arange(g)[None, :]).astype(f32)
    member_t = member.T

    gamma = params["gamma"].reshape(c, 1).astype(f32)
    beta = params["beta"].reshape(c, 1).astype(f32)
    # fused qkv weight: one (THW,C)x(C,3C) MXU matmul instead of three narrow ones
    wqkv = jnp.concatenate(
        [params["wq"].T, params["wk"].T, params["wv"].T], axis=1).astype(bf)       # (C, 3C)
    bqkv = jnp.concatenate(
        [params["bq"], params["bk"], params["bv"]]).reshape(1, 3 * c).astype(f32)  # (1, 3C)
    wp = params["wp"].astype(bf)                  # (C_out, C_in), used as  wp @ attn^T
    bp = params["bp"].reshape(c, 1).astype(f32)

    # ------------- stage 1: streaming GroupNorm + fused q/k/v projection -------------
    def gn_qkv_kernel(x_ref, gamma_ref, beta_ref, member_ref, member_t_ref,
                      wqkv_ref, bqkv_ref, q_ref, kt_ref, v_ref,
                      sum_sc, sq_sc, scale_sc, shift_sc):
        p = pl.program_id(1)
        ti = pl.program_id(2)
        last = pl.num_programs(2) - 1

        @pl.when(jnp.logical_and(p == 0, ti == 0))
        def _zero_stats():
            sum_sc[...] = jnp.zeros_like(sum_sc)
            sq_sc[...] = jnp.zeros_like(sq_sc)

        @pl.when(p == 0)
        def _accumulate():
            xt = x_ref[0]                                              # (C, THW) f32
            sum_sc[...] += jnp.sum(xt, axis=1, keepdims=True)          # (C, 1)
            sq_sc[...] += jnp.sum(xt * xt, axis=1, keepdims=True)      # (C, 1)

        @pl.when(jnp.logical_and(p == 0, ti == last))
        def _finalize_stats():
            gs = jnp.dot(member_t_ref[...], sum_sc[...],
                         preferred_element_type=jnp.float32)           # (G, 1)
            gq = jnp.dot(member_t_ref[...], sq_sc[...],
                         preferred_element_type=jnp.float32)           # (G, 1)
            gmean = gs * inv_n
            gvar = jnp.maximum(gq * inv_n - gmean * gmean, 0.0)
            mean_c = jnp.dot(member_ref[...], gmean,
                             preferred_element_type=jnp.float32)       # (C, 1)
            var_c = jnp.dot(member_ref[...], gvar,
                            preferred_element_type=jnp.float32)        # (C, 1)
            sc = gamma_ref[...] * lax.rsqrt(var_c + EPS)
            scale_sc[...] = sc
            shift_sc[...] = beta_ref[...] - mean_c * sc

        @pl.when(p == 1)
        def _project():
            xt = x_ref[0]                                              # (C, THW) f32
            hn = xt * scale_sc[...] + shift_sc[...]                    # GroupNorm affine
            hnt = jnp.transpose(hn).astype(jnp.bfloat16)               # (THW, C)
            qkv = jnp.dot(hnt, wqkv_ref[...],
                          preferred_element_type=jnp.float32) + bqkv_ref[...]   # (THW, 3C)
            q_ref[0] = (qkv[:, :c] * q_scale).astype(jnp.bfloat16)     # scale folded into q
            kt_ref[0] = jnp.transpose(qkv[:, c:2 * c]).astype(jnp.bfloat16)     # (C, THW)
            v_ref[0] = qkv[:, 2 * c:].astype(jnp.bfloat16)

    def _inv2(shape):
        # grid-invariant 2-D operand (constant index_map -> DMA'd once, stays resident)
        return pl.BlockSpec(shape, lambda bi, p, ti: (0, 0))

    q_s, kt_s, v_s = pl.pallas_call(
        gn_qkv_kernel,
        out_shape=(jax.ShapeDtypeStruct((b, hw, c), bf),      # q (pre-scaled)
                   jax.ShapeDtypeStruct((b, c, hw), bf),      # K^T
                   jax.ShapeDtypeStruct((b, hw, c), bf)),     # v
        grid_spec=pltpu.PrefetchScalarGridSpec(
            num_scalar_prefetch=0,
            grid=(b, 2, nt),                                  # (batch, pass, hw_tile)
            in_specs=[
                pl.BlockSpec((1, c, thw), lambda bi, p, ti: (bi, 0, ti)),   # x (NCHW)
                _inv2((c, 1)), _inv2((c, 1)),                               # gamma, beta
                _inv2((c, g)), _inv2((g, c)),                               # member, member^T
                _inv2((c, 3 * c)), _inv2((1, 3 * c)),                       # Wqkv^T, bqkv
            ],
            out_specs=[
                # p*ti: during pass 0 every iteration aliases block 0, so no stale block
                # is written back before pass 1 fills it with real data.
                pl.BlockSpec((1, thw, c), lambda bi, p, ti: (bi, p * ti, 0)),   # q
                pl.BlockSpec((1, c, thw), lambda bi, p, ti: (bi, 0, p * ti)),   # K^T
                pl.BlockSpec((1, thw, c), lambda bi, p, ti: (bi, p * ti, 0)),   # v
            ],
            scratch_shapes=[pltpu.VMEM((c, 1), jnp.float32)] * 4,
        ),
        compiler_params=pltpu.CompilerParams(
            dimension_semantics=("parallel", "arbitrary", "arbitrary"),
            vmem_limit_bytes=vmem_limit,
        ),
        cost_estimate=pl.CostEstimate(
            flops=6 * b * hw * c * c,
            transcendentals=b * c,
            bytes_accessed=2 * b * hw * c * 4 + 3 * b * hw * c * 2 + 3 * c * c * 2,
        ),
    )(x_seq, gamma, beta, member, member_t, wqkv, bqkv)

    # -------- stage 2: flash attention (online softmax) + proj_out + residual --------
    def flash_kernel(q_ref, kt_ref, v_ref, x_ref, wp_ref, bp_ref, o_ref,
                     m_sc, l_sc, acc_sc):
        kv = pl.program_id(2)

        @pl.when(kv == 0)
        def _init():
            m_sc[...] = jnp.full_like(m_sc, -jnp.inf)
            l_sc[...] = jnp.zeros_like(l_sc)
            acc_sc[...] = jnp.zeros_like(acc_sc)

        # q already carries 1/sqrt(C); K is pre-transposed -> plain NN matmul, no per-step k.T
        s = jnp.dot(q_ref[0], kt_ref[0], preferred_element_type=jnp.float32)   # (TQ, TK)

        m_prev = m_sc[...]                                               # (TQ, 128)
        m_new = jnp.maximum(m_prev, jnp.max(s, axis=-1, keepdims=True))
        alpha = jnp.exp(m_prev - m_new)
        # TODO(synk): on v6e/v7x a bf16 exp here roughly doubles EUP throughput (keep f32 on v5e).
        pmat = jnp.exp(s - m_new[:, 0:1])                                # (TQ, TK) f32
        l_sc[...] = alpha * l_sc[...] + jnp.sum(pmat, axis=-1, keepdims=True)
        acc_sc[...] = alpha[:, 0:1] * acc_sc[...] + jnp.dot(
            pmat.astype(jnp.bfloat16), v_ref[0], preferred_element_type=jnp.float32)
        m_sc[...] = m_new

        @pl.when(kv == pl.num_programs(2) - 1)
        def _finalize():
            inv_l = pl.reciprocal(l_sc[...][:, 0:1], approx=False)       # exact, once per tile
            attn_t = jnp.transpose(acc_sc[...] * inv_l).astype(jnp.bfloat16)    # (C, TQ)
            out_ct = jnp.dot(wp_ref[...], attn_t,
                             preferred_element_type=jnp.float32) + bp_ref[...]  # (C, TQ)
            o_ref[0] = x_ref[0] + out_ct                                 # residual, NCHW layout

    out = pl.pallas_call(
        flash_kernel,
        out_shape=jax.ShapeDtypeStruct((b, c, hw), jnp.float32),
        grid_spec=pltpu.PrefetchScalarGridSpec(
            num_scalar_prefetch=0,
            grid=(b, nq, nk),
            in_specs=[
                pl.BlockSpec((1, tq, c), lambda bi, qi, ki: (bi, qi, 0)),   # q   (bf16)
                pl.BlockSpec((1, c, tk), lambda bi, qi, ki: (bi, 0, ki)),   # K^T (bf16)
                pl.BlockSpec((1, tk, c), lambda bi, qi, ki: (bi, ki, 0)),   # v   (bf16)
                pl.BlockSpec((1, c, tq), lambda bi, qi, ki: (bi, 0, qi)),   # x residual (f32)
                pl.BlockSpec((c, c), lambda bi, qi, ki: (0, 0)),            # W_p (bf16)
                pl.BlockSpec((c, 1), lambda bi, qi, ki: (0, 0)),            # b_p
            ],
            out_specs=pl.BlockSpec((1, c, tq), lambda bi, qi, ki: (bi, 0, qi)),
            scratch_shapes=[
                pltpu.VMEM((tq, 128), jnp.float32),   # running max   (128 lanes: unmasked st)
                pltpu.VMEM((tq, 128), jnp.float32),   # running denom
                pltpu.VMEM((tq, c), jnp.float32),     # running numerator
            ],
        ),
        compiler_params=pltpu.CompilerParams(
            dimension_semantics=("parallel", "parallel", "arbitrary"),
            vmem_limit_bytes=vmem_limit,
        ),
        cost_estimate=pl.CostEstimate(
            flops=4 * b * hw * hw * c + 2 * b * hw * c * c,
            transcendentals=b * hw * hw,
            bytes_accessed=(b * hw * c * 2) * (1 + 2 * nq) + 2 * b * hw * c * 4 + c * c * 2,
        ),
    )(q_s, kt_s, v_s, x_seq, wp, bp)

    return out.reshape(b, c, h, w)


def attn_block_reference(x, params):
    """Plain-JAX f32 reference mirroring the PyTorch forward (NCHW)."""
    b, c, h, w = x.shape
    g = GROUPS
    xr = x.reshape(b, g, c // g, h, w)
    mean = xr.mean(axis=(2, 3, 4), keepdims=True)
    var = xr.var(axis=(2, 3, 4), keepdims=True)
    hn = ((xr - mean) / jnp.sqrt(var + EPS)).reshape(b, c, h, w)
    hn = hn * params["gamma"].reshape(1, c, 1, 1) + params["beta"].reshape(1, c, 1, 1)

    def conv1x1(t, wgt, bias):
        return jnp.einsum("bchw,oc->bohw", t, wgt) + bias.reshape(1, c, 1, 1)

    q = conv1x1(hn, params["wq"], params["bq"])
    k = conv1x1(hn, params["wk"], params["bk"])
    v = conv1x1(hn, params["wv"], params["bv"])
    q = jnp.transpose(q.reshape(b, c, h * w), (0, 2, 1))
    k = k.reshape(b, c, h * w)
    wmat = jnp.einsum("bic,bcj->bij", q, k) * (float(c) ** -0.5)
    wmat = jax.nn.softmax(wmat, axis=2)
    v = v.reshape(b, c, h * w)
    hh = jnp.einsum("bcj,bij->bci", v, wmat).reshape(b, c, h, w)
    hh = conv1x1(hh, params["wp"], params["bp"])
    return x + hh


if __name__ == "__main__":
    # C multiple of 128 (lane-dense channel axis) and of 32 (GroupNorm); HW=256 with
    # 128-wide tiles exercises both the streaming-GroupNorm and multi-kv flash paths.
    B, C, H, W = 2, 128, 16, 16

    key = jax.random.PRNGKey(0)
    keys = jax.random.split(key, 11)
    params = {
        "gamma": jax.random.normal(keys[0], (C,), jnp.float32) * 0.1 + 1.0,
        "beta":  jax.random.normal(keys[1], (C,), jnp.float32) * 0.1,
        "wq": jax.random.normal(keys[2], (C, C), jnp.float32) * 0.1,
        "bq": jax.random.normal(keys[3], (C,), jnp.float32) * 0.1,
        "wk": jax.random.normal(keys[4], (C, C), jnp.float32) * 0.1,
        "bk": jax.random.normal(keys[5], (C,), jnp.float32) * 0.1,
        "wv": jax.random.normal(keys[6], (C, C), jnp.float32) * 0.1,
        "bv": jax.random.normal(keys[7], (C,), jnp.float32) * 0.1,
        "wp": jax.random.normal(keys[8], (C, C), jnp.float32) * 0.1,
        "bp": jax.random.normal(keys[9], (C,), jnp.float32) * 0.1,
    }
    x = jax.random.normal(keys[10], (B, C, H, W), jnp.float32)

    y = jax.block_until_ready(attn_block_pallas(x, params, tq=128, tk=128, thw=128))
    y_ref = jax.block_until_ready(attn_block_reference(x, params))

    assert y.shape == (B, C, H, W)
    # bf16 MXU operands (f32 accumulation) vs the all-f32 reference -> scale-relative check.
    rel_err = float(jnp.max(jnp.abs(y - y_ref)) / (jnp.max(jnp.abs(y_ref)) + 1e-6))
    assert rel_err < 3e-2, rel_err
    print("KERNEL_OK")
</pallas_src>

<mosaic_0001>
module attributes {stable_mosaic.version = 11 : i64} {
  func.func @gn_qkv_kernel(%arg0: i32, %arg1: i32, %arg2: i32, %arg3: memref<1x128x128xf32, #tpu.memory_space<vmem>>, %arg4: memref<128x1xf32, #tpu.memory_space<vmem>>, %arg5: memref<128x1xf32, #tpu.memory_space<vmem>>, %arg6: memref<128x32xf32, #tpu.memory_space<vmem>>, %arg7: memref<32x128xf32, #tpu.memory_space<vmem>>, %arg8: memref<128x384xbf16, #tpu.memory_space<vmem>>, %arg9: memref<1x384xf32, #tpu.memory_space<vmem>>, %arg10: memref<1x128x128xbf16, #tpu.memory_space<vmem>>, %arg11: memref<1x128x128xbf16, #tpu.memory_space<vmem>>, %arg12: memref<1x128x128xbf16, #tpu.memory_space<vmem>>, %arg13: memref<128x1xf32, #tpu.memory_space<vmem>>, %arg14: memref<128x1xf32, #tpu.memory_space<vmem>>, %arg15: memref<128x1xf32, #tpu.memory_space<vmem>>, %arg16: memref<128x1xf32, #tpu.memory_space<vmem>>) attributes {dimension_semantics = [#tpu.dimension_semantics<parallel>, #tpu.dimension_semantics<arbitrary>, #tpu.dimension_semantics<arbitrary>], iteration_bounds = array<i64: 2, 2, 2>, scalar_prefetch = 0 : i64, scratch_operands = 4 : i64, tpu.core_type = #tpu.core_type<tc>, window_params = [{transform_indices = @transform_0, window_bounds = array<i64: 1, 128, 128>}, {pipeline_mode = #tpu.pipeline_mode<synchronous>, transform_indices = @transform_1, window_bounds = array<i64: 128, 1>}, {pipeline_mode = #tpu.pipeline_mode<synchronous>, transform_indices = @transform_2, window_bounds = array<i64: 128, 1>}, {pipeline_mode = #tpu.pipeline_mode<synchronous>, transform_indices = @transform_3, window_bounds = array<i64: 128, 32>}, {pipeline_mode = #tpu.pipeline_mode<synchronous>, transform_indices = @transform_4, window_bounds = array<i64: 32, 128>}, {pipeline_mode = #tpu.pipeline_mode<synchronous>, transform_indices = @transform_5, window_bounds = array<i64: 128, 384>}, {pipeline_mode = #tpu.pipeline_mode<synchronous>, transform_indices = @transform_6, window_bounds = array<i64: 1, 384>}, {transform_indices = @transform_7, window_bounds = array<i64: 1, 128, 128>}, {transform_indices = @transform_8, window_bounds = array<i64: 1, 128, 128>}, {transform_indices = @transform_9, window_bounds = array<i64: 1, 128, 128>}]} {
    %c0_i32 = arith.constant 0 : i32
    %0 = arith.cmpi eq, %arg1, %c0_i32 : i32
    %c0_i32_0 = arith.constant 0 : i32
    %1 = arith.cmpi eq, %arg2, %c0_i32_0 : i32
    %2 = arith.andi %0, %1 : i1
    %3 = arith.extui %2 : i1 to i32
    %c0_i32_1 = arith.constant 0 : i32
    %4 = arith.cmpi ne, %3, %c0_i32_1 : i32
    scf.if %4 {
      %cst = arith.constant 0.000000e+00 : f32
      %16 = vector.broadcast %cst : f32 to vector<128x1xf32>
      %c0 = arith.constant 0 : index
      %c0_8 = arith.constant 0 : index
      %17 = vector.load %arg13[%c0, %c0_8] : memref<128x1xf32, #tpu.memory_space<vmem>>, vector<128x1xf32>
      tpu.vector_store %arg13[%c0, %c0_8], %16 {strides = array<i32>} : memref<128x1xf32, #tpu.memory_space<vmem>>, vector<128x1xf32>,
      %cst_9 = arith.constant 0.000000e+00 : f32
      %18 = vector.broadcast %cst_9 : f32 to vector<128x1xf32>
      %c0_10 = arith.constant 0 : index
      %c0_11 = arith.constant 0 : index
      %19 = vector.load %arg14[%c0_10, %c0_11] : memref<128x1xf32, #tpu.memory_space<vmem>>, vector<128x1xf32>
      tpu.vector_store %arg14[%c0_10, %c0_11], %18 {strides = array<i32>} : memref<128x1xf32, #tpu.memory_space<vmem>>, vector<128x1xf32>,
    } else {
    }
    %c0_i32_2 = arith.constant 0 : i32
    %5 = arith.cmpi eq, %arg1, %c0_i32_2 : i32
    %6 = arith.extui %5 : i1 to i32
    %c0_i32_3 = arith.constant 0 : i32
    %7 = arith.cmpi ne, %6, %c0_i32_3 : i32
    scf.if %7 {
      %c0 = arith.constant 0 : index
      %c0_8 = arith.constant 0 : index
      %c0_9 = arith.constant 0 : index
      %16 = vector.load %arg3[%c0, %c0_8, %c0_9] : memref<1x128x128xf32, #tpu.memory_space<vmem>>, vector<1x128x128xf32>
      %17 = vector.shape_cast %16 : vector<1x128x128xf32> to vector<128x128xf32>
      %c0_10 = arith.constant 0 : index
      %c0_11 = arith.constant 0 : index
      %18 = vector.load %arg13[%c0_10, %c0_11] : memref<128x1xf32, #tpu.memory_space<vmem>>, vector<128x1xf32>
      %cst = arith.constant dense<0.000000e+00> : vector<128xf32>
      %19 = vector.multi_reduction <add>, %17, %cst [1] : vector<128x128xf32> to vector<128xf32>
      %20 = vector.shape_cast %19 : vector<128xf32> to vector<128x1xf32>
      %21 = arith.addf %18, %20 : vector<128x1xf32>
      %c0_12 = arith.constant 0 : index
      %c0_13 = arith.constant 0 : index
      %22 = vector.load %arg13[%c0_12, %c0_13] : memref<128x1xf32, #tpu.memory_space<vmem>>, vector<128x1xf32>
      tpu.vector_store %arg13[%c0_12, %c0_13], %21 {strides = array<i32>} : memref<128x1xf32, #tpu.memory_space<vmem>>, vector<128x1xf32>,
      %c0_14 = arith.constant 0 : index
      %c0_15 = arith.constant 0 : index
      %23 = vector.load %arg14[%c0_14, %c0_15] : memref<128x1xf32, #tpu.memory_space<vmem>>, vector<128x1xf32>
      %24 = arith.mulf %17, %17 : vector<128x128xf32>
      %cst_16 = arith.constant dense<0.000000e+00> : vector<128xf32>
      %25 = vector.multi_reduction <add>, %24, %cst_16 [1] : vector<128x128xf32> to vector<128xf32>
      %26 = vector.shape_cast %25 : vector<128xf32> to vector<128x1xf32>
      %27 = arith.addf %23, %26 : vector<128x1xf32>
      %c0_17 = arith.constant 0 : index
      %c0_18 = arith.constant 0 : index
      %28 = vector.load %arg14[%c0_17, %c0_18] : memref<128x1xf32, #tpu.memory_space<vmem>>, vector<128x1xf32>
      tpu.vector_store %arg14[%c0_17, %c0_18], %27 {strides = array<i32>} : memref<128x1xf32, #tpu.memory_space<vmem>>, vector<128x1xf32>,
    } else {
    }
    %c0_i32_4 = arith.constant 0 : i32
    %8 = arith.cmpi eq, %arg1, %c0_i32_4 : i32
    %c1_i32 = arith.constant 1 : i32
    %9 = arith.cmpi eq, %arg2, %c1_i32 : i32
    %10 = arith.andi %8, %9 : i1
    %11 = arith.extui %10 : i1 to i32
    %c0_i32_5 = arith.constant 0 : i32
    %12 = arith.cmpi ne, %11, %c0_i32_5 : i32
    scf.if %12 {
      %c0 = arith.constant 0 : index
      %c0_8 = arith.constant 0 : index
      %16 = vector.load %arg7[%c0, %c0_8] : memref<32x128xf32, #tpu.memory_space<vmem>>, vector<32x128xf32>
      %c0_9 = arith.constant 0 : index
      %c0_10 = arith.constant 0 : index
      %17 = vector.load %arg13[%c0_9, %c0_10] : memref<128x1xf32, #tpu.memory_space<vmem>>, vector<128x1xf32>
      %cst = arith.constant dense<0.000000e+00> : vector<32x1xf32>
      %18 = tpu.matmul %16, %17, %cst {dimension_numbers = #tpu.dot_dimension_numbers<[1], [0], [0], [1], [0, 0, 1, 1], [], []>} : vector<32x128xf32>, vector<128x1xf32>, vector<32x1xf32> -> vector<32x1xf32>
      %c0_11 = arith.constant 0 : index
      %c0_12 = arith.constant 0 : index
      %19 = vector.load %arg7[%c0_11, %c0_12] : memref<32x128xf32, #tpu.memory_space<vmem>>, vector<32x128xf32>
      %c0_13 = arith.constant 0 : index
      %c0_14 = arith.constant 0 : index
      %20 = vector.load %arg14[%c0_13, %c0_14] : memref<128x1xf32, #tpu.memory_space<vmem>>, vector<128x1xf32>
      %cst_15 = arith.constant dense<0.000000e+00> : vector<32x1xf32>
      %21 = tpu.matmul %19, %20, %cst_15 {dimension_numbers = #tpu.dot_dimension_numbers<[1], [0], [0], [1], [0, 0, 1, 1], [], []>} : vector<32x128xf32>, vector<128x1xf32>, vector<32x1xf32> -> vector<32x1xf32>
      %cst_16 = arith.constant 9.765625E-4 : f32
      %22 = vector.broadcast %cst_16 : f32 to vector<32x1xf32>
      %23 = arith.mulf %18, %22 : vector<32x1xf32>
      %cst_17 = arith.constant 9.765625E-4 : f32
      %24 = vector.broadcast %cst_17 : f32 to vector<32x1xf32>
      %25 = arith.mulf %21, %24 : vector<32x1xf32>
      %26 = arith.mulf %23, %23 : vector<32x1xf32>
      %27 = arith.subf %25, %26 : vector<32x1xf32>
      %cst_18 = arith.constant 0.000000e+00 : f32
      %28 = vector.broadcast %cst_18 : f32 to vector<32x1xf32>
      %29 = arith.maximumf %27, %28 : vector<32x1xf32>
      %c0_19 = arith.constant 0 : index
      %c0_20 = arith.constant 0 : index
      %30 = vector.load %arg6[%c0_19, %c0_20] : memref<128x32xf32, #tpu.memory_space<vmem>>, vector<128x32xf32>
      %cst_21 = arith.constant dense<0.000000e+00> : vector<128x1xf32>
      %31 = tpu.matmul %30, %23, %cst_21 {dimension_numbers = #tpu.dot_dimension_numbers<[1], [0], [0], [1], [0, 0, 1, 1], [], []>} : vector<128x32xf32>, vector<32x1xf32>, vector<128x1xf32> -> vector<128x1xf32>
      %c0_22 = arith.constant 0 : index
      %c0_23 = arith.constant 0 : index
      %32 = vector.load %arg6[%c0_22, %c0_23] : memref<128x32xf32, #tpu.memory_space<vmem>>, vector<128x32xf32>
      %cst_24 = arith.constant dense<0.000000e+00> : vector<128x1xf32>
      %33 = tpu.matmul %32, %29, %cst_24 {dimension_numbers = #tpu.dot_dimension_numbers<[1], [0], [0], [1], [0, 0, 1, 1], [], []>} : vector<128x32xf32>, vector<32x1xf32>, vector<128x1xf32> -> vector<128x1xf32>
      %c0_25 = arith.constant 0 : index
      %c0_26 = arith.constant 0 : index
      %34 = vector.load %arg4[%c0_25, %c0_26] : memref<128x1xf32, #tpu.memory_space<vmem>>, vector<128x1xf32>
      %cst_27 = arith.constant 9.99999997E-7 : f32
      %35 = vector.broadcast %cst_27 : f32 to vector<128x1xf32>
      %36 = arith.addf %33, %35 : vector<128x1xf32>
      %37 = math.rsqrt %36 : vector<128x1xf32>
      %38 = arith.mulf %34, %37 : vector<128x1xf32>
      %c0_28 = arith.constant 0 : index
      %c0_29 = arith.constant 0 : index
      %39 = vector.load %arg15[%c0_28, %c0_29] : memref<128x1xf32, #tpu.memory_space<vmem>>, vector<128x1xf32>
      tpu.vector_store %arg15[%c0_28, %c0_29], %38 {strides = array<i32>} : memref<128x1xf32, #tpu.memory_space<vmem>>, vector<128x1xf32>,
      %c0_30 = arith.constant 0 : index
      %c0_31 = arith.constant 0 : index
      %40 = vector.load %arg5[%c0_30, %c0_31] : memref<128x1xf32, #tpu.memory_space<vmem>>, vector<128x1xf32>
      %41 = arith.mulf %31, %38 : vector<128x1xf32>
      %42 = arith.subf %40, %41 : vector<128x1xf32>
      %c0_32 = arith.constant 0 : index
      %c0_33 = arith.constant 0 : index
      %43 = vector.load %arg16[%c0_32, %c0_33] : memref<128x1xf32, #tpu.memory_space<vmem>>, vector<128x1xf32>
      tpu.vector_store %arg16[%c0_32, %c0_33], %42 {strides = array<i32>} : memref<128x1xf32, #tpu.memory_space<vmem>>, vector<128x1xf32>,
    } else {
    }
    %c1_i32_6 = arith.constant 1 : i32
    %13 = arith.cmpi eq, %arg1, %c1_i32_6 : i32
    %14 = arith.extui %13 : i1 to i32
    %c0_i32_7 = arith.constant 0 : i32
    %15 = arith.cmpi ne, %14, %c0_i32_7 : i32
    scf.if %15 {
      %c0 = arith.constant 0 : index
      %c0_8 = arith.constant 0 : index
      %c0_9 = arith.constant 0 : index
      %16 = vector.load %arg3[%c0, %c0_8, %c0_9] : memref<1x128x128xf32, #tpu.memory_space<vmem>>, vector<1x128x128xf32>
      %17 = vector.shape_cast %16 : vector<1x128x128xf32> to vector<128x128xf32>
      %c0_10 = arith.constant 0 : index
      %c0_11 = arith.constant 0 : index
      %18 = vector.load %arg15[%c0_10, %c0_11] : memref<128x1xf32, #tpu.memory_space<vmem>>, vector<128x1xf32>
      %19 = vector.broadcast %18 : vector<128x1xf32> to vector<128x128xf32>
      %20 = arith.mulf %17, %19 : vector<128x128xf32>
      %c0_12 = arith.constant 0 : index
      %c0_13 = arith.constant 0 : index
      %21 = vector.load %arg16[%c0_12, %c0_13] : memref<128x1xf32, #tpu.memory_space<vmem>>, vector<128x1xf32>
      %22 = vector.broadcast %21 : vector<128x1xf32> to vector<128x128xf32>
      %23 = arith.addf %20, %22 : vector<128x128xf32>
      %24 = tpu.transpose %23, [1, 0] : vector<128x128xf32> -> vector<128x128xf32>
      %25 = arith.truncf %24 : vector<128x128xf32> to vector<128x128xbf16>
      %c0_14 = arith.constant 0 : index
      %c0_15 = arith.constant 0 : index
      %26 = vector.load %arg8[%c0_14, %c0_15] : memref<128x384xbf16, #tpu.memory_space<vmem>>, vector<128x384xbf16>
      %cst = arith.constant dense<0.000000e+00> : vector<128x384xf32>
      %27 = tpu.matmul %25, %26, %cst {dimension_numbers = #tpu.dot_dimension_numbers<[1], [0], [0], [1], [0, 0, 1, 1], [], []>} : vector<128x128xbf16>, vector<128x384xbf16>, vector<128x384xf32> -> vector<128x384xf32>
      %c0_16 = arith.constant 0 : index
      %c0_17 = arith.constant 0 : index
      %28 = vector.load %arg9[%c0_16, %c0_17] : memref<1x384xf32, #tpu.memory_space<vmem>>, vector<1x384xf32>
      %29 = vector.broadcast %28 : vector<1x384xf32> to vector<128x384xf32>
      %30 = arith.addf %27, %29 : vector<128x384xf32>
      %31 = vector.extract_strided_slice %30 {offsets = [0, 0], sizes = [128, 128], strides = [1, 1]} : vector<128x384xf32> to vector<128x128xf32>
      %cst_18 = arith.constant 0.0883883461 : f32
      %32 = vector.broadcast %cst_18 : f32 to vector<128x128xf32>
      %33 = arith.mulf %31, %32 : vector<128x128xf32>
      %34 = arith.truncf %33 : vector<128x128xf32> to vector<128x128xbf16>
      %c0_19 = arith.constant 0 : index
      %c0_20 = arith.constant 0 : index
      %c0_21 = arith.constant 0 : index
      %35 = vector.load %arg10[%c0_19, %c0_20, %c0_21] : memref<1x128x128xbf16, #tpu.memory_space<vmem>>, vector<1x128x128xbf16>
      %36 = vector.shape_cast %35 : vector<1x128x128xbf16> to vector<128x128xbf16>
      %37 = vector.shape_cast %34 : vector<128x128xbf16> to vector<1x128x128xbf16>
      tpu.vector_store %arg10[%c0_19, %c0_20, %c0_21], %37 {strides = array<i32>} : memref<1x128x128xbf16, #tpu.memory_space<vmem>>, vector<1x128x128xbf16>,
      %38 = vector.extract_strided_slice %30 {offsets = [0, 128], sizes = [128, 128], strides = [1, 1]} : vector<128x384xf32> to vector<128x128xf32>
      %39 = tpu.transpose %38, [1, 0] : vector<128x128xf32> -> vector<128x128xf32>
      %40 = arith.truncf %39 : vector<128x128xf32> to vector<128x128xbf16>
      %c0_22 = arith.constant 0 : index
      %c0_23 = arith.constant 0 : index
      %c0_24 = arith.constant 0 : index
      %41 = vector.load %arg11[%c0_22, %c0_23, %c0_24] : memref<1x128x128xbf16, #tpu.memory_space<vmem>>, vector<1x128x128xbf16>
      %42 = vector.shape_cast %41 : vector<1x128x128xbf16> to vector<128x128xbf16>
      %43 = vector.shape_cast %40 : vector<128x128xbf16> to vector<1x128x128xbf16>
      tpu.vector_store %arg11[%c0_22, %c0_23, %c0_24], %43 {strides = array<i32>} : memref<1x128x128xbf16, #tpu.memory_space<vmem>>, vector<1x128x128xbf16>,
      %44 = vector.extract_strided_slice %30 {offsets = [0, 256], sizes = [128, 128], strides = [1, 1]} : vector<128x384xf32> to vector<128x128xf32>
      %45 = arith.truncf %44 : vector<128x128xf32> to vector<128x128xbf16>
      %c0_25 = arith.constant 0 : index
      %c0_26 = arith.constant 0 : index
      %c0_27 = arith.constant 0 : index
      %46 = vector.load %arg12[%c0_25, %c0_26, %c0_27] : memref<1x128x128xbf16, #tpu.memory_space<vmem>>, vector<1x128x128xbf16>
      %47 = vector.shape_cast %46 : vector<1x128x128xbf16> to vector<128x128xbf16>
      %48 = vector.shape_cast %45 : vector<128x128xbf16> to vector<1x128x128xbf16>
      tpu.vector_store %arg12[%c0_25, %c0_26, %c0_27], %48 {strides = array<i32>} : memref<1x128x128xbf16, #tpu.memory_space<vmem>>, vector<1x128x128xbf16>,
    } else {
    }
    return
  }
  func.func @transform_0(%arg0: i32, %arg1: i32, %arg2: i32) -> (i32, i32, i32) {
    %c0_i32 = arith.constant 0 : i32
    %c0_i32_0 = arith.constant 0 : i32
    return %arg0, %c0_i32, %arg2 : i32, i32, i32
  }
  func.func @transform_1(%arg0: i32, %arg1: i32, %arg2: i32) -> (i32, i32) {
    %c0_i32 = arith.constant 0 : i32
    %c0_i32_0 = arith.constant 0 : i32
    %c0_i32_1 = arith.constant 0 : i32
    return %c0_i32, %c0_i32_0 : i32, i32
  }
  func.func @transform_2(%arg0: i32, %arg1: i32, %arg2: i32) -> (i32, i32) {
    %c0_i32 = arith.constant 0 : i32
    %c0_i32_0 = arith.constant 0 : i32
    %c0_i32_1 = arith.constant 0 : i32
    return %c0_i32, %c0_i32_0 : i32, i32
  }
  func.func @transform_3(%arg0: i32, %arg1: i32, %arg2: i32) -> (i32, i32) {
    %c0_i32 = arith.constant 0 : i32
    %c0_i32_0 = arith.constant 0 : i32
    %c0_i32_1 = arith.constant 0 : i32
    return %c0_i32, %c0_i32_0 : i32, i32
  }
  func.func @transform_4(%arg0: i32, %arg1: i32, %arg2: i32) -> (i32, i32) {
    %c0_i32 = arith.constant 0 : i32
    %c0_i32_0 = arith.constant 0 : i32
    %c0_i32_1 = arith.constant 0 : i32
    return %c0_i32, %c0_i32_0 : i32, i32
  }
  func.func @transform_5(%arg0: i32, %arg1: i32, %arg2: i32) -> (i32, i32) {
    %c0_i32 = arith.constant 0 : i32
    %c0_i32_0 = arith.constant 0 : i32
    %c0_i32_1 = arith.constant 0 : i32
    return %c0_i32, %c0_i32_0 : i32, i32
  }
  func.func @transform_6(%arg0: i32, %arg1: i32, %arg2: i32) -> (i32, i32) {
    %c0_i32 = arith.constant 0 : i32
    %c0_i32_0 = arith.constant 0 : i32
    %c0_i32_1 = arith.constant 0 : i32
    return %c0_i32, %c0_i32_0 : i32, i32
  }
  func.func @transform_7(%arg0: i32, %arg1: i32, %arg2: i32) -> (i32, i32, i32) {
    %0 = arith.muli %arg1, %arg2 : i32
    %c0_i32 = arith.constant 0 : i32
    %c0_i32_0 = arith.constant 0 : i32
    return %arg0, %0, %c0_i32 : i32, i32, i32
  }
  func.func @transform_8(%arg0: i32, %arg1: i32, %arg2: i32) -> (i32, i32, i32) {
    %0 = arith.muli %arg1, %arg2 : i32
    %c0_i32 = arith.constant 0 : i32
    %c0_i32_0 = arith.constant 0 : i32
    return %arg0, %c0_i32, %0 : i32, i32, i32
  }
  func.func @transform_9(%arg0: i32, %arg1: i32, %arg2: i32) -> (i32, i32, i32) {
    %0 = arith.muli %arg1, %arg2 : i32
    %c0_i32 = arith.constant 0 : i32
    %c0_i32_0 = arith.constant 0 : i32
    return %arg0, %0, %c0_i32 : i32, i32, i32
  }
}

</mosaic_0001>

<bundles_post_ra>
// kernel: tpu_custom_call.1
= control target key start
LH: loop header
LB: loop body
LE: loop exit
PB: predicated region body
PF: predicated region fallthrough
CT: control target
= control target key end

     0   :  { %s4952_s0 = inlined_call_operand.hbm [shape: f32[2,128,256], index: 0, kind: input, shape index: {}]   ;;  %s4953_s1 = inlined_call_operand.hbm [shape: f32[128,1], index: 1, kind: input, shape index: {}]   ;;  %s4954_s2 = inlined_call_operand.hbm [shape: f32[128,1], index: 2, kind: input, shape index: {}]   ;;  %s4955_s3 = inlined_call_operand.hbm [shape: f32[128,32], index: 3, kind: input, shape index: {}]   ;;  %s4956_s4 = inlined_call_operand.hbm [shape: f32[32,128], index: 4, kind: input, shape index: {}]   ;;  %s4957_s5 = inlined_call_operand.hbm [shape: bf16[128,384], index: 5, kind: input, shape index: {}]   ;;  %s4958_s6 = inlined_call_operand.hbm [shape: f32[1,384], index: 6, kind: input, shape index: {}]   ;;  %s4959_s7 = inlined_call_operand.hbm [shape: bf16[2,256,128], index: 7, kind: output, shape index: {0}]   ;;  %s4960_s8 = inlined_call_operand.hbm [shape: bf16[2,128,256], index: 8, kind: output, shape index: {1}]   ;;  %s4961_s9 = inlined_call_operand.hbm [shape: bf16[2,256,128], index: 9, kind: output, shape index: {2}]  }
   0x1   :  { %4989 = sst [smem:[#allocation42_spill]] %s4952_s0 }
   0x2   :  { %4990 = sst [smem:[#allocation43_spill]] %s4953_s1 }
   0x3   :  { %4991 = sst [smem:[#allocation44_spill]] %s4954_s2 }
   0x4   :  { %4992 = sst [smem:[#allocation45_spill]] %s4955_s3 }
   0x5   :  { %4993 = sst [smem:[#allocation46_spill]] %s4956_s4 }
   0x6   :  { %4994 = sst [smem:[#allocation47_spill]] %s4957_s5 }
   0x7   :  { %4995 = sst [smem:[#allocation48_spill]] %s4958_s6 }
   0x8   :  { %4996 = sst [smem:[#allocation49_spill]] %s4959_s7 }
   0x9   :  { %4997 = sst [smem:[#allocation50_spill]] %s4960_s8 }
   0xa   :  { %4998 = sst [smem:[#allocation51_spill]] %s4961_s9 }
   0xb   :  { %15 = vsyncpa [#allocation7], 0 }
   0xc   :  { %17 = vsyncpa [#allocation7 + $0x1], 0 }
   0xd   :  { %18 = vsyncpa [#allocation10], 0 }
   0xe   :  { %19 = vsyncpa [#allocation13], 0 }
   0xf   :  { %20 = vsyncpa [#allocation16], 0 }
  0x10   :  { %21 = vsyncpa [#allocation8], 0 }
  0x11   :  { %23 = vsyncpa [#allocation8 + $0x1], 0 }
  0x12   :  { %24 = vsyncpa [#allocation20], 0 }
  0x13   :  { %26 = vsyncpa [#allocation20 + $0x1], 0  ;;  %s4110_s30 = smov 0   ;;  %s4112_s10 = smov 0  }
  0x14   :  { %s4114_s11 = smov 0   ;;  %s4116_s12 = smov 0  }
  0x15   :  { %s4118_s13 = smov 0   ;;  %s4120_s14 = smov 0  }
  0x16   :  { %s4122_s15 = smov 0   ;;  %s4124_s16 = smov 0  }
  0x17   :  { %s4126_s17 = smov 0   ;;  %s4128_s18 = smov 0  }
  0x18   :  { %s4130_s19 = smov 0   ;;  %s4132_s20 = smov 0  }
  0x19   :  { %s4134_s21 = smov 0  }
  0x1a LB: > { %4999 = sst [smem:[#allocation28_spill]] %s3990_s30  ;;  %s4176_s22 = sadd.s32 4294967295, %s4038_s21   ;;  %s4038_s21 = sphi %s4134_s21, %s32_s21   ;;  %s4034_s20 = sphi %s4132_s20, %s5072_s20   ;;  %s4030_s19 = sphi %s4130_s19, %s5071_s19   ;;  %s4026_s18 = sphi %s4128_s18, %s5070_s18   ;;  %s4022_s17 = sphi %s4126_s17, %s5079_s17   ;;  %s4018_s16 = sphi %s4124_s16, %s5068_s16   ;;  %s4014_s15 = sphi %s4122_s15, %s5067_s15   ;;  %s4010_s14 = sphi %s4120_s14, %s5078_s14   ;;  %s4006_s13 = sphi %s4118_s13, %s5077_s13   ;;  %s4002_s12 = sphi %s4116_s12, %s5076_s12   ;;  %s3998_s11 = sphi %s4114_s11, %s5075_s11   ;;  %s3994_s10 = sphi %s4112_s10, %s5074_s10   ;;  %s3990_s30 = sphi %s4110_s30, %s5064_s30  }
  0x1b   : > { %5000 = sst [smem:[#allocation29_spill]] %s3994_s10  ;;  %p2687_p0 = scmp.ge.s32.totalorder %s4038_s21, 1 }
  0x1c   : > { %5001 = sst [smem:[#allocation30_spill]] %s4010_s14  ;;  %p4975_p1 = scmp.eq.s32.totalorder %s4176_s22, 0 }
  0x1d   : > { %5002 = sst [smem:[#allocation31_spill]] %s4014_s15  ;;  %p300_p3 = scmp.lt.s32.totalorder %s4038_s21, 9 }
  0x1e   : > { %5003 = sst [smem:[#allocation32_spill]] %s4018_s16  ;;  %s4040_s24 = smov [#allocation9]  }
  0x1f   : > { %5004 = sst [smem:[#allocation33_spill]] %s4022_s17  ;;  %p4182_p4 = pnand %p2687_p0, %p300_p3 }
  0x20   : > { %5005 = sst [smem:[#allocation34_spill]] %s4026_s18  ;;  %s312_s25 = sshll.u32 %s4040_s24, 4  ;;  %s4186_s25 = int_to_ptr.vmem [resolvable:$true] %s312_s25 }
  0x21   : > { %5006 = sst [smem:[#allocation35_spill]] %s4030_s19  ;;  %p3397_p5 = pneg %p4182_p4 }
  0x22   : > { %5007 = sst [smem:[#allocation36_spill]] %s4034_s20  ;;  %s4041_s27 = smov [#allocation12]  }
  0x23   : > { %s5008_s23 = scalar_select %p4182_p4, 1, 0 }
  0x24   : > { %p4192_p6 = pnand %p3397_p5, %p4975_p1  ;;  %s338_s28 = sshll.u32 %s4041_s27, 4  ;;  %s4196_s28 = int_to_ptr.vmem [resolvable:$true] %s338_s28 }
  0x25   : > { %5009 = sst [smem:[#allocation37_spill]] %s5008_s23  ;;  %s4042_s29 = smov [#allocation15]  }
  0x26   : > { %s364_s9 = sshll.u32 %s4042_s29, 4  ;;  %s5011_s1 = sld [smem:[#allocation43_spill]]  ;;  %s4198_s9 = int_to_ptr.vmem [resolvable:$true] %s364_s9 }
  0x27   : > { %p4208_p8 = pneg %p4192_p6 }
  0x2c   : > { %s3630_s8 = scalar_lea.hbm %s5011_s1, 2048 }
  0x2d   : > { %p3631_p7 = scmp.ne.s32.totalorder %s5011_s1, %s3630_s8  ;;  %p3637_p11 = scmp.lt.u32.totalorder %s3630_s8, %s5011_s1 }
  0x2f   : > { %p3633_p9 = pnand %p4208_p8, %p3631_p7 }
  0x31   : > { %p3634_p10 = pneg %p3633_p9 }
  0x33   : > { %p3639_p12 = pnand %p3637_p11, %p3634_p10 }
  0x35   : > { %3642 = shalt.err (!%p3639_p12)
}
  0x36   : > { %s3643_s7 = scalar_lea.vmem %s4186_s25, 2048  ;;  %p3651_p5 = scmp.lt.s32.totalorder %s4186_s25, %s4186_s25 }
  0x37   : > { %p3644_p13 = scmp.ne.s32.totalorder %s4186_s25, %s3643_s7  ;;  %p3652_p2 = scmp.lt.s32.totalorder %s3643_s7, %s3643_s7 }
  0x39   : > { %p3646_p0 = pnand %p3644_p13, %p4208_p8  ;;  %p3653_p7 = por %p3652_p2, %p3651_p5 }
  0x3b   : > { %p3647_p3 = pneg %p3646_p0 }
  0x3d   : > { %p3654_p9 = pnand %p3653_p7, %p3647_p3 }
  0x3f   : > { %3657 = shalt.err (!%p3654_p9)
}
  0x40   : > { %s4971_s15 = smov 128   ;;  %s4973_s8 = smov 8  }
  0x41   : > { %3400 = dma.hbm_to_vmem [thread:$0]  (!%p4192_p6), %s5011_s1, 2048, %s4186_s25, [#allocation10], %s4971_s15, %s4971_s15, %s4973_s8  }
  0x42   : > { %s5013_s3 = sld [smem:[#allocation45_spill]] }
  0x48   : > { %s3658_s7 = scalar_lea.hbm %s5013_s3, 2048 }
  0x49   : > { %p3659_p2 = scmp.ne.s32.totalorder %s5013_s3, %s3658_s7  ;;  %p3665_p12 = scmp.lt.u32.totalorder %s3658_s7, %s5013_s3 }
  0x4b   : > { %p3661_p10 = pnand %p3659_p2, %p4208_p8 }
  0x4d   : > { %p3662_p11 = pneg %p3661_p10 }
  0x4f   : > { %p3667_p13 = pnand %p3665_p12, %p3662_p11 }
  0x51   : > { %3670 = shalt.err (!%p3667_p13)
}
  0x52   : > { %s3671_s25 = scalar_lea.vmem %s4196_s28, 2048  ;;  %p3679_p7 = scmp.lt.s32.totalorder %s4196_s28, %s4196_s28 }
  0x53   : > { %p3672_p0 = scmp.ne.s32.totalorder %s4196_s28, %s3671_s25  ;;  %p3680_p9 = scmp.lt.s32.totalorder %s3671_s25, %s3671_s25 }
  0x55   : > { %p3674_p3 = pnand %p3672_p0, %p4208_p8  ;;  %p3681_p2 = por %p3680_p9, %p3679_p7 }
  0x57   : > { %p3675_p5 = pneg %p3674_p3 }
  0x59   : > { %p3682_p10 = pnand %p3681_p2, %p3675_p5 }
  0x5b   : > { %3685 = shalt.err (!%p3682_p10)
}
  0x5c   : > { %3406 = dma.hbm_to_vmem [thread:$0]  (!%p4192_p6), %s5013_s3, 2048, %s4196_s28, [#allocation13], %s4971_s15, %s4971_s15, %s4973_s8  }
  0x5d   : > { %s5014_s5 = sld [smem:[#allocation47_spill]] }
  0x63   : > { %s3686_s17 = scalar_lea.hbm %s5014_s5, 3072 }
  0x64   : > { %p3687_p11 = scmp.ne.s32.totalorder %s5014_s5, %s3686_s17  ;;  %p3693_p0 = scmp.lt.u32.totalorder %s3686_s17, %s5014_s5 }
  0x66   : > { %p3689_p12 = pnand %p3687_p11, %p4208_p8 }
  0x68   : > { %p3690_p13 = pneg %p3689_p12 }
  0x6a   : > { %p3695_p3 = pnand %p3693_p0, %p3690_p13 }
  0x6c   : > { %3698 = shalt.err (!%p3695_p3)
}
  0x6d   : > { %s3699_s28 = scalar_lea.vmem %s4198_s9, 3072  ;;  %p3707_p2 = scmp.lt.s32.totalorder %s4198_s9, %s4198_s9 }
  0x6e   : > { %p3700_p5 = scmp.ne.s32.totalorder %s4198_s9, %s3699_s28  ;;  %p3708_p10 = scmp.lt.s32.totalorder %s3699_s28, %s3699_s28 }
  0x70   : > { %p3702_p7 = pnand %p3700_p5, %p4208_p8  ;;  %p3709_p11 = por %p3708_p10, %p3707_p2 }
  0x72   : > { %p3703_p9 = pneg %p3702_p7 }
  0x74   : > { %p3710_p12 = pnand %p3709_p11, %p3703_p9 }
  0x76   : > { %3713 = shalt.err (!%p3710_p12)
}
  0x77   : > { %s4045_s25 = smov 192   ;;  %s4046_s0 = smov 12  }
  0x78   : > { %3412 = dma.hbm_to_vmem [thread:$0]  (!%p4192_p6), %s5014_s5, 3072, %s4198_s9, [#allocation16], %s4045_s25, %s4045_s25, %s4046_s0  }
  0x79   : > { %s4047_s23 = smov [#allocation11]   ;;  %s4048_s24 = smov [#allocation14]  }
  0x7a   : > { %s325_s17 = sshll.u32 %s4047_s23, 4  ;;  %s351_s27 = sshll.u32 %s4048_s24, 4  ;;  %s326_s17 = int_to_ptr.vmem [resolvable:$true] %s325_s17  ;;  %s4281_s27 = int_to_ptr.vmem [resolvable:$true] %s351_s27 }
  0x7b   : > { %s5015_s2 = sld [smem:[#allocation44_spill]] }
  0x81   : > { %s3714_s28 = scalar_lea.hbm %s5015_s2, 2048 }
  0x82   : > { %p3715_p13 = scmp.ne.s32.totalorder %s5015_s2, %s3714_s28  ;;  %p3721_p5 = scmp.lt.u32.totalorder %s3714_s28, %s5015_s2 }
  0x84   : > { %p3717_p0 = pnand %p3715_p13, %p4208_p8 }
  0x86   : > { %p3718_p3 = pneg %p3717_p0 }
  0x88   : > { %p3723_p7 = pnand %p3721_p5, %p3718_p3 }
  0x8a   : > { %3726 = shalt.err (!%p3723_p7)
}
  0x8b   : > { %s3727_s25 = scalar_lea.vmem %s326_s17, 2048  ;;  %p3735_p11 = scmp.lt.s32.totalorder %s326_s17, %s326_s17 }
  0x8c   : > { %p3728_p9 = scmp.ne.s32.totalorder %s326_s17, %s3727_s25  ;;  %p3736_p12 = scmp.lt.s32.totalorder %s3727_s25, %s3727_s25 }
  0x8e   : > { %p3730_p2 = pnand %p3728_p9, %p4208_p8  ;;  %p3737_p1 = por %p3736_p12, %p3735_p11 }
  0x90   : > { %p3731_p10 = pneg %p3730_p2 }
  0x92   : > { %p3738_p4 = pnand %p3737_p1, %p3731_p10 }
  0x94   : > { %3741 = shalt.err (!%p3738_p4)
}
  0x95   : > { %s5016_s15 = smov 8   ;;  %s5017_s8 = smov 128  }
  0x96   : > { %3403 = dma.hbm_to_vmem [thread:$0]  (!%p4192_p6), %s5015_s2, 2048, %s326_s17, [#allocation10], %s5017_s8, %s5017_s8, %s5016_s15  }
  0x97   : > { %s5018_s4 = sld [smem:[#allocation46_spill]] }
  0x9d   : > { %s3742_s29 = scalar_lea.hbm %s5018_s4, 512 }
  0x9e   : > { %p3743_p13 = scmp.ne.s32.totalorder %s5018_s4, %s3742_s29  ;;  %p3749_p0 = scmp.lt.u32.totalorder %s3742_s29, %s5018_s4 }
  0xa0   : > { %p3745_p1 = pnand %p3743_p13, %p4208_p8 }
  0xa2   : > { %p3746_p4 = pneg %p3745_p1 }
  0xa4   : > { %p3751_p3 = pnand %p3749_p0, %p3746_p4 }
  0xa6   : > { %3754 = shalt.err (!%p3751_p3)
}
  0xa7   : > { %s3755_s17 = scalar_lea.vmem %s4281_s27, 512  ;;  %p3763_p2 = scmp.lt.s32.totalorder %s4281_s27, %s4281_s27 }
  0xa8   : > { %p3756_p5 = scmp.ne.s32.totalorder %s4281_s27, %s3755_s17  ;;  %p3764_p10 = scmp.lt.s32.totalorder %s3755_s17, %s3755_s17 }
  0xaa   : > { %p3758_p7 = pnand %p3756_p5, %p4208_p8  ;;  %p3765_p11 = por %p3764_p10, %p3763_p2 }
  0xac   : > { %p3759_p9 = pneg %p3758_p7 }
  0xae   : > { %p3766_p12 = pnand %p3765_p11, %p3759_p9 }
  0xb0   : > { %3769 = shalt.err (!%p3766_p12)
}
  0xb1   : > { %3409 = dma.hbm_to_vmem [thread:$0]  (!%p4192_p6), %s5018_s4, 512, %s4281_s27, [#allocation13], %s5017_s8, %s5017_s8, %s5016_s15  }
  0xb2   : > { %s4049_s10 = smov [#allocation17]   ;;  %s5019_s6 = sld [smem:[#allocation48_spill]] }
  0xb3   : > { %s378_s23 = sshll.u32 %s4049_s10, 4  ;;  %s379_s23 = int_to_ptr.vmem [resolvable:$true] %s378_s23 }
  0xb8   : > { %s3770_s7 = scalar_lea.hbm %s5019_s6, 48 }
  0xb9   : > { %p3771_p13 = scmp.ne.s32.totalorder %s5019_s6, %s3770_s7  ;;  %p3777_p0 = scmp.lt.u32.totalorder %s3770_s7, %s5019_s6 }
  0xbb   : > { %p3773_p1 = pnand %p3771_p13, %p4208_p8 }
  0xbd   : > { %p3774_p4 = pneg %p3773_p1 }
  0xbf   : > { %p3779_p3 = pnand %p3777_p0, %p3774_p4 }
  0xc1   : > { %3782 = shalt.err (!%p3779_p3)
}
  0xc2   : > { %s3783_s27 = scalar_lea.vmem %s379_s23, 48  ;;  %s3790_s25 = scalar_lea.vmem %s379_s23, 64 }
  0xc3   : > { %p3784_p5 = scmp.ne.s32.totalorder %s379_s23, %s3783_s27  ;;  %p3791_p2 = scmp.lt.s32.totalorder %s379_s23, %s379_s23 }
  0xc4   : > { %p3792_p10 = scmp.lt.s32.totalorder %s3790_s25, %s3783_s27 }
  0xc5   : > { %p3786_p7 = pnand %p3784_p5, %p4208_p8 }
  0xc6   : > { %p3793_p11 = por %p3792_p10, %p3791_p2 }
  0xc7   : > { %p3787_p9 = pneg %p3786_p7 }
  0xc9   : > { %p3794_p12 = pnand %p3793_p11, %p3787_p9 }
  0xcb   : > { %3797 = shalt.err (!%p3794_p12)
}
  0xcc   : > { %3415 = dma.hbm_to_vmem [thread:$0]  (!%p4192_p6), %s5019_s6, 48, %s379_s23, [#allocation16]  }
  0xcd   : > { %s4977_s16 = sadd.s32 4294967294, %s4038_s21   ;;  %s44_s26 = sadd.s32 1, %s4026_s18 }
  0xce   : > { %s47_s24 = sadd.s32 1, %s4030_s19  ;;  %p45_p8 = scmp.ge.s32.totalorder %s44_s26, 2 }
  0xcf   : > { %s51_s29 = sadd.s32 1, %s4034_s20  ;;  %p67_p13 = scmp.ne.s32.totalorder %s4010_s14, %s4006_s13 }
  0xd0   : > { %s5020_s28 = sld [smem:[#allocation29_spill]]  ;;  %s5081_s26 = smov (%p45_p8, %s44_s26), 0 }
  0xd1   : > { %5021 = sst [smem:[#allocation38_spill]] %s5081_s26  ;;  %s5083_s24 = smov (!%p45_p8, %s47_s24), %s4030_s19 }
  0xd2   : > { %s56_s30 = ssub.s32 %s4026_s18, %s5081_s26  ;;  %s5022_s23 = sld [smem:[#allocation28_spill]] }
  0xd3   : > { %p68_p6 = scmp.eq.s32.totalorder %s4038_s21, 0  ;;  %p49_p1 = scmp.ge.s32.totalorder %s5083_s24, 2 }
  0xd4   : > { %p73_p4 = scmp.ne.s32.totalorder %s4006_s13, %s4002_s12  ;;  %s209_s17 = smul.u32 %s4026_s18, %s4030_s19 }
  0xd5   : > { %p4363_p0 = por %p68_p6, %p67_p13  ;;  %s5085_s24 = smov (%p49_p1, %s5083_s24), 0 }
  0xd6   : > { %5024 = sst [smem:[#allocation39_spill]] %s5085_s24  ;;  %s5087_s29 = smov (!%p49_p1, %s51_s29), %s4034_s20 }
  0xd7   : > { %p5025_p3 = scmp.eq.s32.totalorder %s4176_s22, 0  ;;  %s210_s25 = smul.u32 %s5085_s24, %s5081_s26 }
  0xd8   : > { %p53_p7 = scmp.ge.s32.totalorder %s5087_s29, 2  ;;  %s216_s12 = sadd.s32 1, %s3998_s11 }
  0xd9   : > { %p4374_p5 = por %p5025_p3, %p73_p4  ;;  %s212_s0 = ssub.s32 %s209_s17, %s210_s25 }
  0xda   : > { %p226_p9 = scmp.ne.s32.totalorder %s3998_s11, %s5020_s28  ;;  %s5089_s29 = smov (%p53_p7, %s5087_s29), 0 }
  0xdb   : > { %5027 = sst [smem:[#allocation40_spill]] %s5089_s29  ;;  %p5028_p2 = scmp.eq.s32.totalorder %s4176_s22, 7 }
  0xdc   : > { %p232_p11 = scmp.ne.s32.totalorder %s5020_s28, %s5022_s23  ;;  %s55_s7 = ssub.s32 %s4034_s20, %s5089_s29 }
  0xdd   : > { %p4387_p10 = por %p5028_p2, %p226_p9  ;;  %p233_p12 = scmp.eq.s32.totalorder %s4977_s16, 7 }
  0xde   : > { %s57_s1 = sor.u32 %s56_s30, %s55_s7  ;;  %s213_s2 = sor.u32 %s212_s0, %s55_s7 }
  0xdf   : > { %s5029_s10 = scalar_select %p4387_p10, 1, 0 }
  0xe0   : > { %p58_p8 = scmp.eq.s32.totalorder %s57_s1, 0  ;;  %p214_p13 = scmp.eq.s32.totalorder %s213_s2, 0 }
  0xe1   : > { %p4397_p6 = por %p233_p12, %p232_p11  ;;  %p3436_p1 = scmp.lt.s32.totalorder %s4038_s21, 8 }
  0xe2   : > { %s5031_s25 = sadd.s32 1, %s4010_s14  ;;  %s389_s5 = sand.u32 1, %s4010_s14  }
  0xe3   : > { %s5030_s17 = scalar_select %p4397_p6, 1, 0 }
  0xe4   : > { %s4405_s3 = scalar_select %p58_p8, %s4010_s14, %s5031_s25  }
  0xe5   : > { %s4408_s4 = scalar_select %p214_p13, %s3998_s11, %s216_s12  }
  0xe6   : > { %5032 = sst [smem:[#allocation41_spill]] %s4405_s3  ;;  %s2696_s28 = sshll.u32 %s4034_s20, 5 }
  0xe7   : > { %s2695_s23 = sshll.u32 %s389_s5, 7  ;;  %s398_s6 = sadd.s32 %s4026_s18, %s2696_s28 }
  0xe8   : > { %s2697_s16 = sshll.u32 %s398_s6, 7  ;;  %s393_s30 = scalar_lea.vmem [#allocation6], %s2695_s23 }
  0xe9   : > { %s401_s7 = sshll.u32 %s393_s30, 4  ;;  %s5033_s2 = sld [smem:[#allocation42_spill]]  ;;  %s4418_s7 = int_to_ptr.vmem [resolvable:$true] %s401_s7 }
  0xea   : > { %p4422_p4 = pnand %p3436_p1, %p4363_p0  ;;  %s4426_s6 = scalar_lea.sflag [#allocation7], %s389_s5 }
  0xec   : > { %p3800_p7 = pneg %p4422_p4 }
  0xef   : > { %s4416_s29 = scalar_lea.hbm %s5033_s2, %s2697_s16  ;;  %s3803_s9 = scalar_lea.hbm %s5033_s2, 8192 }
  0xf0   : > { %s3798_s25 = scalar_lea.hbm %s4416_s29, 2048  ;;  %p3804_p0 = scmp.lt.u32.totalorder %s4416_s29, %s5033_s2 }
  0xf1   : > { %p3799_p3 = scmp.ne.s32.totalorder %s4416_s29, %s3798_s25  ;;  %p3805_p11 = scmp.lt.u32.totalorder %s3803_s9, %s3798_s25 }
  0xf2   : > { %p3807_p8 = scmp.lt.u32.totalorder %s3798_s25, %s4416_s29 }
  0xf3   : > { %p3801_p9 = pnand %p3800_p7, %p3799_p3  ;;  %p3806_p12 = por %p3805_p11, %p3804_p0 }
  0xf5   : > { %p3802_p2 = pneg %p3801_p9  ;;  %p3808_p13 = por %p3807_p8, %p3806_p12 }
  0xf7   : > { %p3809_p1 = pnand %p3808_p13, %p3802_p2 }
  0xf9   : > { %3812 = shalt.err (!%p3809_p1)
}
  0xfa   : > { %s3813_s5 = scalar_lea.vmem %s4418_s7, 2048  ;;  %s4050_s0 = smov [#allocation6]  }
  0xfb   : > { %p3814_p3 = scmp.ne.s32.totalorder %s4418_s7, %s3813_s5  ;;  %s3818_s1 = sshll.u32 %s4050_s0, 4  ;;  %s3819_s1 = int_to_ptr.vmem [resolvable:$false] %s3818_s1 }
  0xfc   : > { %s3820_s16 = scalar_lea.vmem %s3819_s1, 4096  ;;  %p3821_p10 = scmp.lt.s32.totalorder %s4418_s7, %s3819_s1 }
  0xfd   : > { %p3816_p9 = pnand %p3814_p3, %p3800_p7  ;;  %p3822_p0 = scmp.lt.s32.totalorder %s3820_s16, %s3813_s5 }
  0xff   : > { %p3817_p6 = pneg %p3816_p9  ;;  %p3823_p11 = por %p3822_p0, %p3821_p10 }
 0x101   : > { %p3824_p12 = pnand %p3823_p11, %p3817_p6 }
 0x103   : > { %3827 = shalt.err (!%p3824_p12)
}
 0x104   : > { %s4051_s25 = smov 256   ;;  %s5035_s28 = sld [smem:[#allocation37_spill]] }
 0x105   : > { %3419 = dma.hbm_to_vmem [thread:$0]  (!%p4422_p4), %s4416_s29, 2048, %s4418_s7, %s4426_s6, %s4051_s25, %s5017_s8, %s5016_s15  }
 0x10a   : > { %p5036_p7 = scmp.ne.s32.totalorder %s5035_s28, 0 }
 0x10b   : > { %s415_s9 = sand.u32 (!%p5036_p7), 1, %s4006_s13  }
 0x10c   : > { %413 = sbr.rel (%p5036_p7) target bundleno = 1832 (0x728), region = 48  ;;  %s2699_s23 = sshll.u32 (!%p5036_p7), %s415_s9, 7 }
 0x10d   : > { %s416_s30 = scalar_lea.sflag (!%p5036_p7), [#allocation7], %s415_s9  ;;  %s4459_s5 = scalar_lea.vmem (!%p5036_p7), [#allocation6], %s2699_s23 }
 0x113   : > { %3965 = dma.done.wait (%p4374_p5), %s416_s30, 2048  }
 0x114   : > { %3967 = vsyncadd (%p4374_p5), %s416_s30, 4294965248  ;;  %p5037_p10 = scmp.eq.s32.totalorder %s4176_s22, 0 }
 0x116   : > { %3969 = dma.done.wait (%p5037_p10), [#allocation10], 4096   ;;  %p5038_p6 = pmov %p5037_p10 }
 0x118   : > { %3971 = vsyncadd (%p5038_p6), [#allocation10], 4294963200  ;;  %p5039_p4 = pmov %p5038_p6 }
 0x11a   : > { %3973 = dma.done.wait (%p5039_p4), [#allocation13], 2560   ;;  %p5040_p2 = pmov %p5039_p4 }
 0x11c   : > { %3975 = vsyncadd (%p5040_p2), [#allocation13], 4294964736  ;;  %p5041_p8 = pmov %p5040_p2 }
 0x11d   : > { %p5042_p13 = pmov %p5040_p2 }
 0x11e   : > { %3977 = dma.done.wait (%p5041_p8), [#allocation16], 3120  }
 0x11f   : > { %3979 = vsyncadd (%p5042_p13), [#allocation16], 4294964176  ;;  %s5043_s15 = sld [smem:[#allocation29_spill]]  ;;  %s5044_s8 = sld [smem:[#allocation32_spill]] }
 0x120   : > { %s5045_s29 = sld [smem:[#allocation31_spill]] }
 0x125   : > { %s4980_s27 = sand.u32 1, %s5043_s15   ;;  %p494_p5 = scmp.eq.s32.totalorder %s5044_s8, 0 }
 0x126   : > { %s2706_s7 = sshll.u32 %s4980_s27, 6  ;;  %p495_p1 = scmp.eq.s32.totalorder %s5045_s29, 0 }
 0x127   : > { %s4484_s12 = scalar_lea.vmem [#allocation18], %s2706_s7  ;;  %s4486_s6 = scalar_lea.vmem [#allocation19], %s2706_s7 }
 0x128   : > { %p496_p3 = pnand %p495_p1, %p494_p5  ;;  %s4488_s0 = scalar_lea.vmem [#allocation21], %s2706_s7 }
 0x129   : > { %vm500_vm0 = vcmask (!%p496_p3), 7168   ;;  %v4052_v0 = vmov (!%p496_p3), 0.0  }
 0x12a   : > { %499 = sbr.rel (%p496_p3) target bundleno = 314 (0x13a), region = 80  ;;  %501 = vst.msk [vmem:[#allocation2] sm:$0xff] (!%p496_p3), %vm500_vm0, %v4052_v0  ;;  %502 = vst.msk [vmem:[#allocation2 + $0x8] sm:$0xff] (!%p496_p3), %vm500_vm0, %v4052_v0 }
 0x12b   : > { %503 = vst.msk [vmem:[#allocation2 + $0x10] sm:$0xff] (!%p496_p3), %vm500_vm0, %v4052_v0  ;;  %504 = vst.msk [vmem:[#allocation2 + $0x18] sm:$0xff] (!%p496_p3), %vm500_vm0, %v4052_v0 }
 0x12c   : > { %505 = vst.msk [vmem:[#allocation2 + $0x20] sm:$0xff] (!%p496_p3), %vm500_vm0, %v4052_v0  ;;  %506 = vst.msk [vmem:[#allocation2 + $0x28] sm:$0xff] (!%p496_p3), %vm500_vm0, %v4052_v0 }
 0x12d   : > { %507 = vst.msk [vmem:[#allocation2 + $0x30] sm:$0xff] (!%p496_p3), %vm500_vm0, %v4052_v0  ;;  %508 = vst.msk [vmem:[#allocation2 + $0x38] sm:$0xff] (!%p496_p3), %vm500_vm0, %v4052_v0 }
 0x12e   : > { %509 = vst.msk [vmem:[#allocation2 + $0x40] sm:$0xff] (!%p496_p3), %vm500_vm0, %v4052_v0  ;;  %510 = vst.msk [vmem:[#allocation2 + $0x48] sm:$0xff] (!%p496_p3), %vm500_vm0, %v4052_v0 }
 0x12f   : > { %511 = vst.msk [vmem:[#allocation2 + $0x50] sm:$0xff] (!%p496_p3), %vm500_vm0, %v4052_v0  ;;  %512 = vst.msk [vmem:[#allocation2 + $0x58] sm:$0xff] (!%p496_p3), %vm500_vm0, %v4052_v0 }
 0x130   : > { %513 = vst.msk [vmem:[#allocation2 + $0x60] sm:$0xff] (!%p496_p3), %vm500_vm0, %v4052_v0  ;;  %514 = vst.msk [vmem:[#allocation2 + $0x68] sm:$0xff] (!%p496_p3), %vm500_vm0, %v4052_v0 }
 0x131   : > { %515 = vst.msk [vmem:[#allocation2 + $0x70] sm:$0xff] %vm500_vm0, %v4052_v0  ;;  %516 = vst.msk [vmem:[#allocation2 + $0x78] sm:$0xff] %vm500_vm0, %v4052_v0 }
 0x132   : > { %517 = vst.msk [vmem:[#allocation3] sm:$0xff] %vm500_vm0, %v4052_v0  ;;  %518 = vst.msk [vmem:[#allocation3 + $0x8] sm:$0xff] %vm500_vm0, %v4052_v0 }
 0x133   : > { %519 = vst.msk [vmem:[#allocation3 + $0x10] sm:$0xff] %vm500_vm0, %v4052_v0  ;;  %520 = vst.msk [vmem:[#allocation3 + $0x18] sm:$0xff] %vm500_vm0, %v4052_v0 }
 0x134   : > { %521 = vst.msk [vmem:[#allocation3 + $0x20] sm:$0xff] %vm500_vm0, %v4052_v0  ;;  %522 = vst.msk [vmem:[#allocation3 + $0x28] sm:$0xff] %vm500_vm0, %v4052_v0 }
 0x135   : > { %523 = vst.msk [vmem:[#allocation3 + $0x30] sm:$0xff] %vm500_vm0, %v4052_v0  ;;  %524 = vst.msk [vmem:[#allocation3 + $0x38] sm:$0xff] %vm500_vm0, %v4052_v0 }
 0x136   : > { %525 = vst.msk [vmem:[#allocation3 + $0x40] sm:$0xff] %vm500_vm0, %v4052_v0  ;;  %526 = vst.msk [vmem:[#allocation3 + $0x48] sm:$0xff] %vm500_vm0, %v4052_v0 }
 0x137   : > { %527 = vst.msk [vmem:[#allocation3 + $0x50] sm:$0xff] %vm500_vm0, %v4052_v0  ;;  %528 = vst.msk [vmem:[#allocation3 + $0x58] sm:$0xff] %vm500_vm0, %v4052_v0 }
 0x138   : > { %529 = vst.msk [vmem:[#allocation3 + $0x60] sm:$0xff] %vm500_vm0, %v4052_v0  ;;  %530 = vst.msk [vmem:[#allocation3 + $0x68] sm:$0xff] %vm500_vm0, %v4052_v0 }
 0x139   : > { %531 = vst.msk [vmem:[#allocation3 + $0x70] sm:$0xff] %vm500_vm0, %v4052_v0  ;;  %532 = vst.msk [vmem:[#allocation3 + $0x78] sm:$0xff] %vm500_vm0, %v4052_v0 }
 0x13a PF: > { %s5046_s1 = sld [smem:[#allocation32_spill]] }
 0x140   : > { %p2709_p9 = scmp.ne.s32.totalorder %s5046_s1, 0 }
 0x141   : > { %v538_v1 = vld [vmem:[%s4459_s5 + $0x10] sm:$0xff] (!%p2709_p9)  ;;  %v536_v2 = vld [vmem:[%s4459_s5] sm:$0xff] (!%p2709_p9)  ;;  %v539_v3 = vld [vmem:[%s4459_s5 + $0x18] sm:$0xff] (!%p2709_p9)  ;;  %vm616_vm1 = vcmask (!%p2709_p9), 7168  }
 0x142   : > { %535 = sbr.rel (%p2709_p9) target bundleno = 527 (0x20f), region = 84  ;;  %572 = vadd.xlane.f32.xlu1 (!%p2709_p9), %v538_v1  ;;  %568 = vadd.xlane.f32.xlu0 (!%p2709_p9), %v536_v2  ;;  %v537_v4 = vld [vmem:[%s4459_s5 + $0x8] sm:$0xff] (!%p2709_p9)  ;;  %v540_v6 = vld [vmem:[%s4459_s5 + $0x20] sm:$0xff] (!%p2709_p9)  ;;  %v543_v7 = vld [vmem:[%s4459_s5 + $0x38] sm:$0xff] (!%p2709_p9)  ;;  %v649_v18 = vmul.f32 (!%p2709_p9), %v536_v2, %v536_v2  ;;  %v652_v19 = vmul.f32 (!%p2709_p9), %v539_v3, %v539_v3  ;;  %v651_v20 = vmul.f32 (!%p2709_p9), %v538_v1, %v538_v1 }
 0x143   : > { %v541_v5 = vld [vmem:[%s4459_s5 + $0x28] sm:$0xff] (!%p2709_p9)  ;;  %v542_v8 = vld [vmem:[%s4459_s5 + $0x30] sm:$0xff] (!%p2709_p9)  ;;  %v544_v10 = vld [vmem:[%s4459_s5 + $0x40] sm:$0xff] (!%p2709_p9)  ;;  %v650_v17 = vmul.f32 (!%p2709_p9), %v537_v4, %v537_v4  ;;  %v653_v22 = vmul.f32 (!%p2709_p9), %v540_v6, %v540_v6  ;;  %v656_v23 = vmul.f32 (!%p2709_p9), %v543_v7, %v543_v7 }
 0x144   : > { %v545_v9 = vld [vmem:[%s4459_s5 + $0x48] sm:$0xff] (!%p2709_p9)  ;;  %v547_v11 = vld [vmem:[%s4459_s5 + $0x58] sm:$0xff] (!%p2709_p9)  ;;  %v546_v12 = vld [vmem:[%s4459_s5 + $0x50] sm:$0xff] (!%p2709_p9)  ;;  %v654_v21 = vmul.f32 (!%p2709_p9), %v541_v5, %v541_v5  ;;  %v655_v24 = vmul.f32 (!%p2709_p9), %v542_v8, %v542_v8  ;;  %v657_v26 = vmul.f32 (!%p2709_p9), %v544_v10, %v544_v10 }
 0x145   : > { %v549_v13 = vld [vmem:[%s4459_s5 + $0x68] sm:$0xff] (!%p2709_p9)  ;;  %v548_v14 = vld [vmem:[%s4459_s5 + $0x60] sm:$0xff] (!%p2709_p9)  ;;  %v551_v15 = vld [vmem:[%s4459_s5 + $0x78] sm:$0xff] (!%p2709_p9)  ;;  %v658_v25 = vmul.f32 (!%p2709_p9), %v545_v9, %v545_v9  ;;  %v660_v27 = vmul.f32 (!%p2709_p9), %v547_v11, %v547_v11  ;;  %v659_v28 = vmul.f32 (!%p2709_p9), %v546_v12, %v546_v12 }
 0x146   : > { %574 = vadd.xlane.f32.xlu1 (!%p2709_p9), %v539_v3  ;;  %570 = vadd.xlane.f32.xlu0 (!%p2709_p9), %v537_v4  ;;  %v550_v16 = vld [vmem:[%s4459_s5 + $0x70] sm:$0xff] (!%p2709_p9)  ;;  %v662_v29 = vmul.f32 (!%p2709_p9), %v549_v13, %v549_v13  ;;  %v661_v30 = vmul.f32 (!%p2709_p9), %v548_v14, %v548_v14  ;;  %v664_v31 = vmul.f32 (!%p2709_p9), %v551_v15, %v551_v15  ;;  %v552_v34 = vld [vmem:[#allocation2] sm:$0xff] (!%p2709_p9)  ;;  %v555_v39 = vld [vmem:[#allocation2 + $0x18] sm:$0xff] (!%p2709_p9) }
 0x147   : > { %v663_v32 = vmul.f32 (!%p2709_p9), %v550_v16, %v550_v16  ;;  %v554_v33 = vld [vmem:[#allocation2 + $0x10] sm:$0xff] (!%p2709_p9)  ;;  %v553_v40 = vld [vmem:[#allocation2 + $0x8] sm:$0xff] (!%p2709_p9)  ;;  %v556_v46 = vld [vmem:[#allocation2 + $0x20] sm:$0xff] (!%p2709_p9) }
 0x148   : > { %v557_v45 = vld [vmem:[#allocation2 + $0x28] sm:$0xff] (!%p2709_p9)  ;;  %v559_v51 = vld [vmem:[#allocation2 + $0x38] sm:$0xff] (!%p2709_p9)  ;;  %v558_v52 = vld [vmem:[#allocation2 + $0x30] sm:$0xff] (!%p2709_p9) }
 0x149   : > { %v561_v57 = vld [vmem:[#allocation2 + $0x48] sm:$0xff]  ;;  %v560_v58 = vld [vmem:[#allocation2 + $0x40] sm:$0xff]  ;;  %v563_v63 = vld [vmem:[#allocation2 + $0x58] sm:$0xff] }
 0x14a   : > { %578 = vadd.xlane.f32.xlu1 %v541_v5  ;;  %576 = vadd.xlane.f32.xlu0 %v540_v6  ;;  %v562_v0 = vld [vmem:[#allocation2 + $0x50] sm:$0xff]  ;;  %v565_v5 = vld [vmem:[#allocation2 + $0x68] sm:$0xff]  ;;  %v564_v6 = vld [vmem:[#allocation2 + $0x60] sm:$0xff] }
 0x14e   : > { %582 = vadd.xlane.f32.xlu1 %v543_v7  ;;  %580 = vadd.xlane.f32.xlu0 %v542_v8 }
 0x152   : > { %586 = vadd.xlane.f32.xlu1 %v545_v9  ;;  %584 = vadd.xlane.f32.xlu0 %v544_v10 }
 0x156   : > { %590 = vadd.xlane.f32.xlu1 %v547_v11  ;;  %588 = vadd.xlane.f32.xlu0 %v546_v12  ;;  %v567_v11 = vld [vmem:[#allocation2 + $0x78] sm:$0xff]  ;;  %v566_v12 = vld [vmem:[#allocation2 + $0x70] sm:$0xff] }
 0x15a   : > { %594 = vadd.xlane.f32.xlu1 %v549_v13  ;;  %592 = vadd.xlane.f32.xlu0 %v548_v14 }
 0x15e   : > { %598 = vadd.xlane.f32.xlu1 %v551_v15  ;;  %596 = vadd.xlane.f32.xlu0 %v550_v16 }
 0x162   : > { %667 = vadd.xlane.f32.xlu1 %v650_v17  ;;  %665 = vadd.xlane.f32.xlu0 %v649_v18  ;;  %v634_v17 = vld [vmem:[#allocation3 + $0x8] sm:$0xff]  ;;  %v633_v18 = vld [vmem:[#allocation3] sm:$0xff] }
 0x166   : > { %671 = vadd.xlane.f32.xlu1 %v652_v19  ;;  %669 = vadd.xlane.f32.xlu0 %v651_v20 }
 0x16a   : > { %675 = vadd.xlane.f32.xlu1 %v654_v21  ;;  %673 = vadd.xlane.f32.xlu0 %v653_v22 }
 0x16e   : > { %679 = vadd.xlane.f32.xlu1 %v656_v23  ;;  %677 = vadd.xlane.f32.xlu0 %v655_v24  ;;  %v636_v23 = vld [vmem:[#allocation3 + $0x18] sm:$0xff]  ;;  %v635_v24 = vld [vmem:[#allocation3 + $0x10] sm:$0xff] }
 0x172   : > { %683 = vadd.xlane.f32.xlu1 %v658_v25  ;;  %681 = vadd.xlane.f32.xlu0 %v657_v26 }
 0x176   : > { %687 = vadd.xlane.f32.xlu1 %v660_v27  ;;  %685 = vadd.xlane.f32.xlu0 %v659_v28 }
 0x17a   : > { %691 = vadd.xlane.f32.xlu1 %v662_v29  ;;  %689 = vadd.xlane.f32.xlu0 %v661_v30  ;;  %v638_v29 = vld [vmem:[#allocation3 + $0x28] sm:$0xff]  ;;  %v637_v30 = vld [vmem:[#allocation3 + $0x20] sm:$0xff] }
 0x17e   : > { %695 = vadd.xlane.f32.xlu1 %v664_v31  ;;  %693 = vadd.xlane.f32.xlu0 %v663_v32 }
 0x1cf   : > { %v573_v35 = vpop.xlane.xlu1 %572  ;;  %v569_v36 = vpop.xlane.xlu0 %568 }
 0x1d0   : > { %v602_v37 = vadd.f32 %v573_v35, %v554_v33  ;;  %v600_v38 = vadd.f32 %v569_v36, %v552_v34  ;;  %v640_v35 = vld [vmem:[#allocation3 + $0x38] sm:$0xff]  ;;  %v639_v36 = vld [vmem:[#allocation3 + $0x30] sm:$0xff] }
 0x1d2   : > { %619 = vst.msk [vmem:[#allocation2 + $0x10] sm:$0xff] %vm616_vm1, %v602_v37  ;;  %617 = vst.msk [vmem:[#allocation2] sm:$0xff] %vm616_vm1, %v600_v38 }
 0x1d3   : > { %v575_v41 = vpop.xlane.xlu1 %574  ;;  %v571_v42 = vpop.xlane.xlu0 %570 }
 0x1d4   : > { %v603_v43 = vadd.f32 %v575_v41, %v555_v39  ;;  %v601_v44 = vadd.f32 %v571_v42, %v553_v40  ;;  %v642_v41 = vld [vmem:[#allocation3 + $0x48] sm:$0xff]  ;;  %v641_v42 = vld [vmem:[#allocation3 + $0x40] sm:$0xff] }
 0x1d6   : > { %620 = vst.msk [vmem:[#allocation2 + $0x18] sm:$0xff] %vm616_vm1, %v603_v43  ;;  %618 = vst.msk [vmem:[#allocation2 + $0x8] sm:$0xff] %vm616_vm1, %v601_v44 }
 0x1d7   : > { %v579_v47 = vpop.xlane.xlu1 %578  ;;  %v577_v48 = vpop.xlane.xlu0 %576 }
 0x1d8   : > { %v605_v49 = vadd.f32 %v579_v47, %v557_v45  ;;  %v604_v50 = vadd.f32 %v577_v48, %v556_v46  ;;  %v644_v47 = vld [vmem:[#allocation3 + $0x58] sm:$0xff]  ;;  %v643_v48 = vld [vmem:[#allocation3 + $0x50] sm:$0xff] }
 0x1da   : > { %622 = vst.msk [vmem:[#allocation2 + $0x28] sm:$0xff] %vm616_vm1, %v605_v49  ;;  %621 = vst.msk [vmem:[#allocation2 + $0x20] sm:$0xff] %vm616_vm1, %v604_v50 }
 0x1db   : > { %v583_v53 = vpop.xlane.xlu1 %582  ;;  %v581_v54 = vpop.xlane.xlu0 %580 }
 0x1dc   : > { %v607_v55 = vadd.f32 %v583_v53, %v559_v51  ;;  %v606_v56 = vadd.f32 %v581_v54, %v558_v52  ;;  %v646_v53 = vld [vmem:[#allocation3 + $0x68] sm:$0xff]  ;;  %v645_v54 = vld [vmem:[#allocation3 + $0x60] sm:$0xff] }
 0x1de   : > { %624 = vst.msk [vmem:[#allocation2 + $0x38] sm:$0xff] %vm616_vm1, %v607_v55  ;;  %623 = vst.msk [vmem:[#allocation2 + $0x30] sm:$0xff] %vm616_vm1, %v606_v56 }
 0x1df   : > { %v587_v59 = vpop.xlane.xlu1 %586  ;;  %v585_v60 = vpop.xlane.xlu0 %584 }
 0x1e0   : > { %v609_v61 = vadd.f32 %v587_v59, %v561_v57  ;;  %v608_v62 = vadd.f32 %v585_v60, %v560_v58  ;;  %v648_v59 = vld [vmem:[#allocation3 + $0x78] sm:$0xff]  ;;  %v647_v60 = vld [vmem:[#allocation3 + $0x70] sm:$0xff] }
 0x1e2   : > { %626 = vst.msk [vmem:[#allocation2 + $0x48] sm:$0xff] %vm616_vm1, %v609_v61  ;;  %625 = vst.msk [vmem:[#allocation2 + $0x40] sm:$0xff] %vm616_vm1, %v608_v62 }
 0x1e3   : > { %v591_v1 = vpop.xlane.xlu1 %590  ;;  %v589_v2 = vpop.xlane.xlu0 %588 }
 0x1e4   : > { %v611_v3 = vadd.f32 %v591_v1, %v563_v63  ;;  %v610_v4 = vadd.f32 %v589_v2, %v562_v0 }
 0x1e6   : > { %628 = vst.msk [vmem:[#allocation2 + $0x58] sm:$0xff] %vm616_vm1, %v611_v3  ;;  %627 = vst.msk [vmem:[#allocation2 + $0x50] sm:$0xff] %vm616_vm1, %v610_v4 }
 0x1e7   : > { %v595_v7 = vpop.xlane.xlu1 %594  ;;  %v593_v8 = vpop.xlane.xlu0 %592 }
 0x1e8   : > { %v613_v9 = vadd.f32 %v595_v7, %v565_v5  ;;  %v612_v10 = vadd.f32 %v593_v8, %v564_v6 }
 0x1ea   : > { %630 = vst.msk [vmem:[#allocation2 + $0x68] sm:$0xff] %vm616_vm1, %v613_v9  ;;  %629 = vst.msk [vmem:[#allocation2 + $0x60] sm:$0xff] %vm616_vm1, %v612_v10 }
 0x1eb   : > { %v599_v13 = vpop.xlane.xlu1 %598  ;;  %v597_v14 = vpop.xlane.xlu0 %596 }
 0x1ec   : > { %v615_v15 = vadd.f32 %v599_v13, %v567_v11  ;;  %v614_v16 = vadd.f32 %v597_v14, %v566_v12 }
 0x1ee   : > { %632 = vst.msk [vmem:[#allocation2 + $0x78] sm:$0xff] %vm616_vm1, %v615_v15  ;;  %631 = vst.msk [vmem:[#allocation2 + $0x70] sm:$0xff] %vm616_vm1, %v614_v16 }
 0x1ef   : > { %v668_v19 = vpop.xlane.xlu1 %667  ;;  %v666_v20 = vpop.xlane.xlu0 %665 }
 0x1f0   : > { %v698_v21 = vadd.f32 %v668_v19, %v634_v17  ;;  %v697_v22 = vadd.f32 %v666_v20, %v633_v18 }
 0x1f2   : > { %714 = vst.msk [vmem:[#allocation3 + $0x8] sm:$0xff] %vm616_vm1, %v698_v21  ;;  %713 = vst.msk [vmem:[#allocation3] sm:$0xff] %vm616_vm1, %v697_v22 }
 0x1f3   : > { %v672_v25 = vpop.xlane.xlu1 %671  ;;  %v670_v26 = vpop.xlane.xlu0 %669 }
 0x1f4   : > { %v700_v27 = vadd.f32 %v672_v25, %v636_v23  ;;  %v699_v28 = vadd.f32 %v670_v26, %v635_v24 }
 0x1f6   : > { %716 = vst.msk [vmem:[#allocation3 + $0x18] sm:$0xff] %vm616_vm1, %v700_v27  ;;  %715 = vst.msk [vmem:[#allocation3 + $0x10] sm:$0xff] %vm616_vm1, %v699_v28 }
 0x1f7   : > { %v676_v31 = vpop.xlane.xlu1 %675  ;;  %v674_v32 = vpop.xlane.xlu0 %673 }
 0x1f8   : > { %v702_v33 = vadd.f32 %v676_v31, %v638_v29  ;;  %v701_v34 = vadd.f32 %v674_v32, %v637_v30 }
 0x1fa   : > { %718 = vst.msk [vmem:[#allocation3 + $0x28] sm:$0xff] %vm616_vm1, %v702_v33  ;;  %717 = vst.msk [vmem:[#allocation3 + $0x20] sm:$0xff] %vm616_vm1, %v701_v34 }
 0x1fb   : > { %v680_v37 = vpop.xlane.xlu1 %679  ;;  %v678_v38 = vpop.xlane.xlu0 %677 }
 0x1fc   : > { %v704_v39 = vadd.f32 %v680_v37, %v640_v35  ;;  %v703_v40 = vadd.f32 %v678_v38, %v639_v36 }
 0x1fe   : > { %720 = vst.msk [vmem:[#allocation3 + $0x38] sm:$0xff] %vm616_vm1, %v704_v39  ;;  %719 = vst.msk [vmem:[#allocation3 + $0x30] sm:$0xff] %vm616_vm1, %v703_v40 }
 0x1ff   : > { %v684_v43 = vpop.xlane.xlu1 %683  ;;  %v682_v44 = vpop.xlane.xlu0 %681 }
 0x200   : > { %v706_v45 = vadd.f32 %v684_v43, %v642_v41  ;;  %v705_v46 = vadd.f32 %v682_v44, %v641_v42 }
 0x202   : > { %722 = vst.msk [vmem:[#allocation3 + $0x48] sm:$0xff] %vm616_vm1, %v706_v45  ;;  %721 = vst.msk [vmem:[#allocation3 + $0x40] sm:$0xff] %vm616_vm1, %v705_v46 }
 0x203   : > { %v688_v49 = vpop.xlane.xlu1 %687  ;;  %v686_v50 = vpop.xlane.xlu0 %685 }
 0x204   : > { %v708_v51 = vadd.f32 %v688_v49, %v644_v47  ;;  %v707_v52 = vadd.f32 %v686_v50, %v643_v48 }
 0x206   : > { %724 = vst.msk [vmem:[#allocation3 + $0x58] sm:$0xff] %vm616_vm1, %v708_v51  ;;  %723 = vst.msk [vmem:[#allocation3 + $0x50] sm:$0xff] %vm616_vm1, %v707_v52 }
 0x207   : > { %v692_v55 = vpop.xlane.xlu1 %691  ;;  %v690_v56 = vpop.xlane.xlu0 %689 }
 0x208   : > { %v710_v57 = vadd.f32 %v692_v55, %v646_v53  ;;  %v709_v58 = vadd.f32 %v690_v56, %v645_v54 }
 0x20a   : > { %726 = vst.msk [vmem:[#allocation3 + $0x68] sm:$0xff] %vm616_vm1, %v710_v57  ;;  %725 = vst.msk [vmem:[#allocation3 + $0x60] sm:$0xff] %vm616_vm1, %v709_v58 }
 0x20b   : > { %v696_v61 = vpop.xlane.xlu1 %695  ;;  %v694_v62 = vpop.xlane.xlu0 %693 }
 0x20c   : > { %v712_v63 = vadd.f32 %v696_v61, %v648_v59  ;;  %v711_v0 = vadd.f32 %v694_v62, %v647_v60 }
 0x20e   : > { %728 = vst.msk [vmem:[#allocation3 + $0x78] sm:$0xff] %vm616_vm1, %v712_v63  ;;  %727 = vst.msk [vmem:[#allocation3 + $0x70] sm:$0xff] %vm616_vm1, %v711_v0 }
 0x20f PF: > { %s5047_s16 = sld [smem:[#allocation31_spill]] }
 0x215   : > { %p729_p0 = scmp.eq.s32.totalorder %s5047_s16, 1 }
 0x217   : > { %p730_p11 = pnand %p729_p0, %p494_p5 }
 0x218   : > { %v738_v1 = vld [vmem:[#allocation2] sm:$0xff] (!%p730_p11)  ;;  %v739_v2 = vld [vmem:[#allocation2 + $0x8] sm:$0xff] (!%p730_p11)  ;;  %v740_v6 = vld [vmem:[#allocation2 + $0x10] sm:$0xff] (!%p730_p11)  ;;  %vm976_vm2 = vcmask (!%p730_p11), 261120   ;;  %vm1363_vm3 = vcmask (!%p730_p11), 7168  }
 0x219   : > { %733 = sbr.rel (%p730_p11) target bundleno = 1063 (0x427), region = 88  ;;  %v839_v3 = vld [vmem:[#allocation3] sm:$0xff] (!%p730_p11)  ;;  %v3285_v4 = vpack.c.bf16 (!%p730_p11), %v739_v2, %v738_v1  ;;  %v840_v5 = vld [vmem:[#allocation3 + $0x8] sm:$0xff] (!%p730_p11)  ;;  %v741_v7 = vld [vmem:[#allocation2 + $0x18] sm:$0xff] (!%p730_p11) }
 0x21a   : > { %v3317_v8 = vpack.c.bf16 (!%p730_p11), %v840_v5, %v839_v3  ;;  %v3289_v9 = vpack.c.bf16 (!%p730_p11), %v741_v7, %v740_v6  ;;  %v841_v10 = vld [vmem:[#allocation3 + $0x10] sm:$0xff] (!%p730_p11)  ;;  %v842_v11 = vld [vmem:[#allocation3 + $0x18] sm:$0xff] (!%p730_p11)  ;;  %v742_v12 = vld [vmem:[#allocation2 + $0x20] sm:$0xff] (!%p730_p11) }
 0x21b   : > { %3286 = vmatprep.subr.bf16.mxu0 (!%p730_p11), %v3285_v4  ;;  %v3321_v13 = vpack.c.bf16 (!%p730_p11), %v842_v11, %v841_v10  ;;  %v743_v14 = vld [vmem:[#allocation2 + $0x28] sm:$0xff] (!%p730_p11)  ;;  %v843_v15 = vld [vmem:[#allocation3 + $0x20] sm:$0xff] (!%p730_p11)  ;;  %v744_v19 = vld [vmem:[#allocation2 + $0x30] sm:$0xff] (!%p730_p11) }
 0x21c   : > { %v844_v16 = vld [vmem:[#allocation3 + $0x28] sm:$0xff] (!%p730_p11)  ;;  %3288 = vmatpush3.bf16.msra.mxu0 (!%p730_p11), %v3285_v4  ;;  %3318 = vmatprep.subr.bf16.mxu1 (!%p730_p11), %v3317_v8  ;;  %v3293_v17 = vpack.c.bf16 (!%p730_p11), %v743_v14, %v742_v12  ;;  %v745_v20 = vld [vmem:[#allocation2 + $0x38] sm:$0xff] (!%p730_p11)  ;;  %v845_v21 = vld [vmem:[#allocation3 + $0x30] sm:$0xff] (!%p730_p11) }
 0x21d   : > { %3320 = vmatpush3.bf16.msra.mxu1 (!%p730_p11), %v3317_v8  ;;  %3290 = vmatprep.subr.bf16.mxu0 (!%p730_p11), %v3289_v9  ;;  %v3325_v18 = vpack.c.bf16 (!%p730_p11), %v844_v16, %v843_v15  ;;  %v846_v22 = vld [vmem:[#allocation3 + $0x38] sm:$0xff] (!%p730_p11)  ;;  %v3297_v23 = vpack.c.bf16 (!%p730_p11), %v745_v20, %v744_v19  ;;  %v746_v25 = vld [vmem:[#allocation2 + $0x40] sm:$0xff] (!%p730_p11)  ;;  %v747_v26 = vld [vmem:[#allocation2 + $0x48] sm:$0xff] (!%p730_p11) }
 0x21e   : > { %3322 = vmatprep.subr.bf16.mxu1 (!%p730_p11), %v3321_v13  ;;  %v3329_v24 = vpack.c.bf16 (!%p730_p11), %v846_v22, %v845_v21  ;;  %v734_v27 = vld [vmem:[#allocation14] sm:$0xff] (!%p730_p11)  ;;  %v848_v29 = vld [vmem:[#allocation3 + $0x48] sm:$0xff] (!%p730_p11)  ;;  %v3301_v30 = vpack.c.bf16 (!%p730_p11), %v747_v26, %v746_v25  ;;  %v748_v32 = vld [vmem:[#allocation2 + $0x50] sm:$0xff] (!%p730_p11) }
 0x21f   : > { %v847_v28 = vld [vmem:[#allocation3 + $0x40] sm:$0xff] (!%p730_p11)  ;;  %3145 = vmatprep.mubr.f32.mxu0 (!%p730_p11), %v734_v27  ;;  %3183 = vmatprep.mubr.f32.mxu1 (!%p730_p11), %v734_v27  ;;  %v749_v33 = vld [vmem:[#allocation2 + $0x58] sm:$0xff] (!%p730_p11)  ;;  %v849_v34 = vld [vmem:[#allocation3 + $0x50] sm:$0xff] (!%p730_p11) }
 0x220   : > { %3292 = vmatpush3.bf16.msra.mxu0 %v3289_v9  ;;  %v3333_v31 = vpack.c.bf16 %v848_v29, %v847_v28  ;;  %v850_v35 = vld [vmem:[#allocation3 + $0x58] sm:$0xff]  ;;  %v3305_v36 = vpack.c.bf16 %v749_v33, %v748_v32  ;;  %v750_v38 = vld [vmem:[#allocation2 + $0x60] sm:$0xff]  ;;  %v751_v39 = vld [vmem:[#allocation2 + $0x68] sm:$0xff] }
 0x221   : > { %3324 = vmatpush3.bf16.msra.mxu1 %v3321_v13  ;;  %3294 = vmatprep.subr.bf16.mxu0 %v3293_v17  ;;  %v3337_v37 = vpack.c.bf16 %v850_v35, %v849_v34  ;;  %v851_v40 = vld [vmem:[#allocation3 + $0x60] sm:$0xff]  ;;  %v852_v41 = vld [vmem:[#allocation3 + $0x68] sm:$0xff]  ;;  %v3309_v42 = vpack.c.bf16 %v751_v39, %v750_v38  ;;  %v752_v44 = vld [vmem:[#allocation2 + $0x70] sm:$0xff] }
 0x222   : > { %3326 = vmatprep.subr.bf16.mxu1 %v3325_v18  ;;  %v3341_v43 = vpack.c.bf16 %v852_v41, %v851_v40  ;;  %v753_v45 = vld [vmem:[#allocation2 + $0x78] sm:$0xff]  ;;  %v853_v46 = vld [vmem:[#allocation3 + $0x70] sm:$0xff]  ;;  %v735_v50 = vld [vmem:[#allocation14 + $0x8] sm:$0xff] }
 0x223   : > { %v854_v47 = vld [vmem:[#allocation3 + $0x78] sm:$0xff]  ;;  %v3313_v48 = vpack.c.bf16 %v753_v45, %v752_v44  ;;  %v736_v51 = vld [vmem:[#allocation14 + $0x10] sm:$0xff]  ;;  %v960_v53 = vld [vmem:[#allocation12] sm:$0xff] }
 0x224   : > { %3296 = vmatpush3.bf16.msra.mxu0 %v3293_v17  ;;  %v3345_v49 = vpack.c.bf16 %v854_v47, %v853_v46  ;;  %v737_v52 = vld [vmem:[#allocation14 + $0x18] sm:$0xff]  ;;  %v961_v21 = vld [vmem:[#allocation12 + $0x8] sm:$0xff]  ;;  %v964_v25 = vld [vmem:[#allocation12 + $0x20] sm:$0xff] }
 0x225   : > { %3328 = vmatpush3.bf16.msra.mxu1 %v3325_v18  ;;  %3298 = vmatprep.subr.bf16.mxu0 %v3297_v23  ;;  %v965_v26 = vld [vmem:[#allocation12 + $0x28] sm:$0xff]  ;;  %v966_v27 = vld [vmem:[#allocation12 + $0x30] sm:$0xff]  ;;  %v967_v28 = vld [vmem:[#allocation12 + $0x38] sm:$0xff] }
 0x226   : > { %3330 = vmatprep.subr.bf16.mxu1 %v3329_v24  ;;  %v968_v29 = vld [vmem:[#allocation12 + $0x40] sm:$0xff]  ;;  %v971_v32 = vld [vmem:[#allocation12 + $0x58] sm:$0xff]  ;;  %v973_v34 = vld [vmem:[#allocation12 + $0x68] sm:$0xff] }
 0x227   : > { %v972_v33 = vld [vmem:[#allocation12 + $0x60] sm:$0xff]  ;;  %v974_v35 = vld [vmem:[#allocation12 + $0x70] sm:$0xff] }
 0x228   : > { %3300 = vmatpush3.bf16.msra.mxu0 %v3297_v23  ;;  %v962_v23 = vld [vmem:[#allocation12 + $0x10] sm:$0xff] }
 0x229   : > { %3332 = vmatpush3.bf16.msra.mxu1 %v3329_v24  ;;  %3302 = vmatprep.subr.bf16.mxu0 %v3301_v30  ;;  %v963_v24 = vld [vmem:[#allocation12 + $0x18] sm:$0xff] }
 0x22a   : > { %3334 = vmatprep.subr.bf16.mxu1 %v3333_v31 }
 0x22c   : > { %3304 = vmatpush3.bf16.msra.mxu0 %v3301_v30  ;;  %v969_v30 = vld [vmem:[#allocation12 + $0x48] sm:$0xff] }
 0x22d   : > { %3336 = vmatpush3.bf16.msra.mxu1 %v3333_v31  ;;  %3306 = vmatprep.subr.bf16.mxu0 %v3305_v36  ;;  %v970_v31 = vld [vmem:[#allocation12 + $0x50] sm:$0xff] }
 0x22e   : > { %3338 = vmatprep.subr.bf16.mxu1 %v3337_v37 }
 0x230   : > { %3308 = vmatpush3.bf16.msra.mxu0 %v3305_v36  ;;  %v975_v36 = vld [vmem:[#allocation12 + $0x78] sm:$0xff] }
 0x231   : > { %3340 = vmatpush3.bf16.msra.mxu1 %v3337_v37  ;;  %3310 = vmatprep.subr.bf16.mxu0 %v3309_v42 }
 0x232   : > { %3342 = vmatprep.subr.bf16.mxu1 %v3341_v43 }
 0x234   : > { %3312 = vmatpush3.bf16.msra.mxu0 %v3309_v42 }
 0x235   : > { %3344 = vmatpush3.bf16.msra.mxu1 %v3341_v43  ;;  %3314 = vmatprep.subr.bf16.mxu0 %v3313_v48 }
 0x236   : > { %3346 = vmatprep.subr.bf16.mxu1 %v3345_v49 }
 0x238   : > { %3316 = vmatpush3.bf16.msra.mxu0 %v3313_v48 }
 0x239   : > { %3348 = vmatpush3.bf16.msra.mxu1 %v3345_v49 }
 0x23b   : > { %3146 = vmatmul.mubr.f32.vlgmr.msra.gmra.mrb[0].mxu0 %v735_v50 }
 0x23c   : > { %3184 = vmatmul.mubr.f32.vlgmr.msra.gmra.mrb[0].mxu1 %v735_v50  ;;  %3148 = vmatprep.mubr.f32.mxu0 %v736_v51 }
 0x23d   : > { %3186 = vmatprep.mubr.f32.mxu1 %v736_v51 }
 0x23f   : > { %3149 = vmatmul.mubr.f32.gmra.mrb[2].mxu0 %v737_v52 }
 0x240   : > { %3187 = vmatmul.mubr.f32.gmra.mrb[2].mxu1 %v737_v52  ;;  %3197 = vmatprep.mubr.msk.f32.mxu0 %vm976_vm2, %v960_v53 }
 0x241   : > { %3229 = vmatprep.mubr.msk.f32.mxu1 %vm976_vm2, %v960_v53 }
 0x30e   : > { %v3147_v54 = vpop.f32.mrb[0].mxu0 }
 0x30f   : > { %v941_v55 = vmul.f32 0.0009765625, %v3147_v54  ;;  %v820_v56 = vpop.f32.mrb[1].mxu0  ;;  %v3185_v57 = vpop.f32.mrb[0].mxu1 }
 0x310   : > { %v940_v58 = vmul.f32 0.0009765625, %v820_v56  ;;  %v945_v59 = vmul.f32 0.0009765625, %v3185_v57  ;;  %v921_v60 = vpop.f32.mrb[1].mxu1 }
 0x311   : > { %v949_v61 = vmul.f32 %v941_v55, %v941_v55  ;;  %v944_v62 = vmul.f32 0.0009765625, %v921_v60 }
 0x312   : > { %v948_v63 = vmul.f32 %v940_v58, %v940_v58  ;;  %v3349_v0 = vpack.c.bf16 %v941_v55, %v940_v58  ;;  %v3150_v1 = vpop.f32.mrb[2].mxu0  ;;  %v1171_v58 = vld [vmem:[#allocation9 + $0x8] sm:$0xff] }
 0x313   : > { %v953_v2 = vsub.f32 %v945_v59, %v949_v61  ;;  %v943_v3 = vmul.f32 0.0009765625, %v3150_v1  ;;  %v830_v4 = vpop.f32.mrb[3].mxu0  ;;  %v3188_v5 = vpop.f32.mrb[2].mxu1  ;;  %v1170_v61 = vld [vmem:[#allocation9] sm:$0xff] }
 0x314   : > { %v952_v6 = vsub.f32 %v944_v62, %v948_v63  ;;  %v942_v7 = vmul.f32 0.0009765625, %v830_v4  ;;  %v947_v8 = vmul.f32 0.0009765625, %v3188_v5  ;;  %v931_v9 = vpop.f32.mrb[3].mxu1  ;;  %3350 = vmatprep.subr.bf16.mxu0 %v3349_v0  ;;  %v1381_v5 = vld [vmem:[#allocation11 + $0x8] sm:$0xff] }
 0x315   : > { %v957_v10 = vmax.f32 %v953_v2, 0.0  ;;  %v951_v11 = vmul.f32 %v943_v3, %v943_v3  ;;  %v946_v12 = vmul.f32 0.0009765625, %v931_v9  ;;  %3352 = vmatpush3.bf16.msra.mxu0 %v3349_v0 }
 0x316   : > { %v956_v13 = vmax.f32 %v952_v6, 0.0  ;;  %v950_v14 = vmul.f32 %v942_v7, %v942_v7  ;;  %v3353_v15 = vpack.c.bf16 %v943_v3, %v942_v7  ;;  %v1173_v7 = vld [vmem:[#allocation9 + $0x18] sm:$0xff] }
 0x317   : > { %v955_v16 = vsub.f32 %v947_v8, %v951_v11 }
 0x318   : > { %v954_v17 = vsub.f32 %v946_v12, %v950_v14  ;;  %3354 = vmatprep.subr.bf16.mxu0 %v3353_v15  ;;  %v3357_v18 = vpack.c.bf16 %v957_v10, %v956_v13  ;;  %v1380_v10 = vld [vmem:[#allocation11] sm:$0xff]  ;;  %v1172_v12 = vld [vmem:[#allocation9 + $0x10] sm:$0xff] }
 0x319   : > { %v959_v19 = vmax.f32 %v955_v16, 0.0  ;;  %3356 = vmatpush3.bf16.msra.mxu0 %v3353_v15 }
 0x31a   : > { %v958_v20 = vmax.f32 %v954_v17, 0.0  ;;  %3358 = vmatprep.subr.bf16.mxu1 %v3357_v18 }
 0x31b   : > { %3360 = vmatpush3.bf16.msra.mxu1 %v3357_v18 }
 0x31c   : > { %v3361_v22 = vpack.c.bf16 %v959_v19, %v958_v20  ;;  %3198 = vmatmul.mubr.msk.f32.vlgmr.msra.gmra.mrb[4].mxu0 %vm976_vm2, %v961_v21 }
 0x31d   : > { %3200 = vmatprep.mubr.msk.f32.mxu0 %vm976_vm2, %v962_v23 }
 0x31e   : > { %3362 = vmatprep.subr.bf16.mxu1 %v3361_v22 }
 0x31f   : > { %3364 = vmatpush3.bf16.msra.mxu1 %v3361_v22 }
 0x320   : > { %3201 = vmatmul.mubr.msk.f32.gmra.mrb[6].mxu0 %vm976_vm2, %v963_v24 }
 0x321   : > { %3203 = vmatprep.mubr.msk.f32.mxu0 %vm976_vm2, %v964_v25 }
 0x322   : > { %3230 = vmatmul.mubr.msk.f32.vlgmr.msra.gmra.mrb[4].mxu1 %vm976_vm2, %v961_v21 }
 0x323   : > { %3232 = vmatprep.mubr.msk.f32.mxu1 %vm976_vm2, %v962_v23  ;;  %v1383_v23 = vld [vmem:[#allocation11 + $0x18] sm:$0xff] }
 0x324   : > { %3204 = vmatmul.mubr.msk.f32.gmra.mrb[8].mxu0 %vm976_vm2, %v965_v26 }
 0x325   : > { %3206 = vmatprep.mubr.msk.f32.mxu0 %vm976_vm2, %v966_v27 }
 0x326   : > { %3233 = vmatmul.mubr.msk.f32.gmra.mrb[6].mxu1 %vm976_vm2, %v963_v24 }
 0x327   : > { %3235 = vmatprep.mubr.msk.f32.mxu1 %vm976_vm2, %v964_v25  ;;  %v1175_v25 = vld [vmem:[#allocation9 + $0x28] sm:$0xff] }
 0x328   : > { %3207 = vmatmul.mubr.msk.f32.gmra.mrb[10].mxu0 %vm976_vm2, %v967_v28 }
 0x329   : > { %3209 = vmatprep.mubr.msk.f32.mxu0 %vm976_vm2, %v968_v29 }
 0x32a   : > { %3236 = vmatmul.mubr.msk.f32.gmra.mrb[8].mxu1 %vm976_vm2, %v965_v26 }
 0x32b   : > { %3238 = vmatprep.mubr.msk.f32.mxu1 %vm976_vm2, %v966_v27 }
 0x32c   : > { %3210 = vmatmul.mubr.msk.f32.gmra.mrb[12].mxu0 %vm976_vm2, %v969_v30 }
 0x32d   : > { %3212 = vmatprep.mubr.msk.f32.mxu0 %vm976_vm2, %v970_v31 }
 0x32e   : > { %3239 = vmatmul.mubr.msk.f32.gmra.mrb[10].mxu1 %vm976_vm2, %v967_v28  ;;  %v1382_v28 = vld [vmem:[#allocation11 + $0x10] sm:$0xff] }
 0x32f   : > { %3241 = vmatprep.mubr.msk.f32.mxu1 %vm976_vm2, %v968_v29 }
 0x330   : > { %3213 = vmatmul.mubr.msk.f32.gmra.mrb[14].mxu0 %vm976_vm2, %v971_v32 }
 0x331   : > { %3215 = vmatprep.mubr.msk.f32.mxu0 %vm976_vm2, %v972_v33 }
 0x332   : > { %3242 = vmatmul.mubr.msk.f32.gmra.mrb[12].mxu1 %vm976_vm2, %v969_v30  ;;  %v1174_v30 = vld [vmem:[#allocation9 + $0x20] sm:$0xff] }
 0x333   : > { %3244 = vmatprep.mubr.msk.f32.mxu1 %vm976_vm2, %v970_v31 }
 0x334   : > { %3216 = vmatmul.mubr.msk.f32.gmra.mrb[16].mxu0 %vm976_vm2, %v973_v34 }
 0x335   : > { %3218 = vmatprep.mubr.msk.f32.mxu0 %vm976_vm2, %v974_v35 }
 0x336   : > { %3245 = vmatmul.mubr.msk.f32.gmra.mrb[14].mxu1 %vm976_vm2, %v971_v32 }
 0x337   : > { %3247 = vmatprep.mubr.msk.f32.mxu1 %vm976_vm2, %v972_v33 }
 0x338   : > { %3219 = vmatmul.mubr.msk.f32.gmra.mrb[18].mxu0 %vm976_vm2, %v975_v36 }
 0x33a   : > { %3248 = vmatmul.mubr.msk.f32.gmra.mrb[16].mxu1 %vm976_vm2, %v973_v34 }
 0x33b   : > { %3250 = vmatprep.mubr.msk.f32.mxu1 %vm976_vm2, %v974_v35 }
 0x33e   : > { %3251 = vmatmul.mubr.msk.f32.gmra.mrb[18].mxu1 %vm976_vm2, %v975_v36 }
 0x3ef   : > { %v3199_v37 = vpop.f32.mrb[4].mxu0 }
 0x3f0   : > { %v1091_v38 = vpop.f32.mrb[5].mxu0 }
 0x3f3   : > { %v4606_v39 = vpop.f32.mrb[6].mxu0 }
 0x3f4   : > { %v4608_v40 = vpop.f32.mrb[7].mxu0 }
 0x3f5   : > { %v3231_v41 = vpop.f32.mrb[4].mxu1 }
 0x3f6   : > { %v1258_v42 = vadd.f32 1e-06, %v3231_v41  ;;  %v1252_v43 = vpop.f32.mrb[5].mxu1 }
 0x3f7   : > { %v1253_v44 = vadd.f32 1e-06, %v1252_v43  ;;  %v4610_v45 = vpop.f32.mrb[8].mxu0 }
 0x3f8   : > { %3564 = vrsqrt.f32 %v1258_v42  ;;  %v4612_v46 = vpop.f32.mrb[9].mxu0 }
 0x3f9   : > { %3566 = vrsqrt.f32 %v1253_v44  ;;  %v3234_v47 = vpop.f32.mrb[6].mxu1  ;;  %v1177_v44 = vld [vmem:[#allocation9 + $0x38] sm:$0xff] }
 0x3fa   : > { %v1268_v48 = vadd.f32 1e-06, %v3234_v47  ;;  %v1262_v49 = vpop.f32.mrb[7].mxu1 }
 0x3fb   : > { %v1263_v50 = vadd.f32 1e-06, %v1262_v49  ;;  %v4614_v51 = vpop.f32.mrb[10].mxu0 }
 0x3fc   : > { %3568 = vrsqrt.f32 %v1268_v48  ;;  %v4616_v52 = vpop.f32.mrb[11].mxu0  ;;  %v1384_v48 = vld [vmem:[#allocation11 + $0x20] sm:$0xff] }
 0x3fd   : > { %3570 = vrsqrt.f32 %v1263_v50  ;;  %v3237_v53 = vpop.f32.mrb[8].mxu1  ;;  %v1176_v50 = vld [vmem:[#allocation9 + $0x30] sm:$0xff] }
 0x3fe   : > { %v1278_v54 = vadd.f32 1e-06, %v3237_v53  ;;  %v1272_v55 = vpop.f32.mrb[9].mxu1 }
 0x3ff   : > { %v1273_v56 = vadd.f32 1e-06, %v1272_v55  ;;  %v4618_v57 = vpop.f32.mrb[12].mxu0 }
 0x400   : > { %3572 = vrsqrt.f32 %v1278_v54  ;;  %v4620_v59 = vpop.f32.mrb[13].mxu0 }
 0x401   : > { %3574 = vrsqrt.f32 %v1273_v56  ;;  %v3240_v60 = vpop.f32.mrb[10].mxu1 }
 0x402   : > { %v3565_v62 = vpop.eup %3564  ;;  %v1288_v63 = vadd.f32 1e-06, %v3240_v60  ;;  %v1282_v0 = vpop.f32.mrb[11].mxu1 }
 0x403   : > { %v3567_v1 = vpop.eup %3566  ;;  %v1283_v2 = vadd.f32 1e-06, %v1282_v0  ;;  %v1348_v3 = vmul.f32 %v3565_v62, %v1171_v58  ;;  %v4622_v4 = vpop.f32.mrb[14].mxu0  ;;  %v1387_v0 = vld [vmem:[#allocation11 + $0x38] sm:$0xff] }
 0x404   : > { %3576 = vrsqrt.f32 %v1288_v63  ;;  %v1347_v6 = vmul.f32 %v3567_v1, %v1170_v61  ;;  %v4624_v8 = vpop.f32.mrb[15].mxu0  ;;  %v1179_v1 = vld [vmem:[#allocation9 + $0x48] sm:$0xff] }
 0x405   : > { %3578 = vrsqrt.f32 %v1283_v2  ;;  %1365 = vst.msk [vmem:[#allocation4 + $0x8] sm:$0xff] %vm1363_vm3, %v1348_v3  ;;  %v1397_v9 = vmul.f32 %v3199_v37, %v1348_v3  ;;  %v3243_v11 = vpop.f32.mrb[12].mxu1  ;;  %v1386_v3 = vld [vmem:[#allocation11 + $0x30] sm:$0xff] }
 0x406   : > { %v3569_v13 = vpop.eup %3568  ;;  %1364 = vst.msk [vmem:[#allocation4] sm:$0xff] %vm1363_vm3, %v1347_v6  ;;  %v1396_v14 = vmul.f32 %v1347_v6, %v1091_v38  ;;  %v1298_v15 = vadd.f32 1e-06, %v3243_v11  ;;  %v1292_v16 = vpop.f32.mrb[13].mxu1 }
 0x407   : > { %v3571_v17 = vpop.eup %3570  ;;  %v1413_v18 = vsub.f32 %v1381_v5, %v1397_v9  ;;  %v1293_v19 = vadd.f32 1e-06, %v1292_v16  ;;  %v1350_v20 = vmul.f32 %v3569_v13, %v1173_v7  ;;  %v4628_v21 = vpop.f32.mrb[16].mxu0  ;;  %v1178_v5 = vld [vmem:[#allocation9 + $0x40] sm:$0xff]  ;;  %v1389_v16 = vld [vmem:[#allocation11 + $0x48] sm:$0xff] }
 0x408   : > { %v1412_v22 = vsub.f32 %v1380_v10, %v1396_v14  ;;  %3580 = vrsqrt.f32 %v1298_v15  ;;  %v1349_v24 = vmul.f32 %v3571_v17, %v1172_v12  ;;  %v4630_v26 = vpop.f32.mrb[17].mxu0  ;;  %v1181_v17 = vld [vmem:[#allocation9 + $0x58] sm:$0xff] }
 0x409   : > { %1429 = vst.msk [vmem:[#allocation5 + $0x8] sm:$0xff] %vm1363_vm3, %v1413_v18  ;;  %3582 = vrsqrt.f32 %v1293_v19  ;;  %1367 = vst.msk [vmem:[#allocation4 + $0x18] sm:$0xff] %vm1363_vm3, %v1350_v20  ;;  %v1399_v27 = vmul.f32 %v4606_v39, %v1350_v20  ;;  %v3246_v29 = vpop.f32.mrb[14].mxu1  ;;  %v1385_v39 = vld [vmem:[#allocation11 + $0x28] sm:$0xff]  ;;  %v1388_v19 = vld [vmem:[#allocation11 + $0x40] sm:$0xff] }
 0x40a   : > { %v3573_v31 = vpop.eup %3572  ;;  %1428 = vst.msk [vmem:[#allocation5] sm:$0xff] %vm1363_vm3, %v1412_v22  ;;  %1366 = vst.msk [vmem:[#allocation4 + $0x10] sm:$0xff] %vm1363_vm3, %v1349_v24  ;;  %v1398_v32 = vmul.f32 %v1349_v24, %v4608_v40  ;;  %v1308_v33 = vadd.f32 1e-06, %v3246_v29  ;;  %v1302_v34 = vpop.f32.mrb[15].mxu1 }
 0x40b   : > { %v3575_v35 = vpop.eup %3574  ;;  %v1415_v36 = vsub.f32 %v1383_v23, %v1399_v27  ;;  %v1303_v37 = vadd.f32 1e-06, %v1302_v34  ;;  %v1352_v38 = vmul.f32 %v3573_v31, %v1175_v25  ;;  %v4638_v41 = vpop.f32.mrb[18].mxu0  ;;  %v1390_v31 = vld [vmem:[#allocation11 + $0x50] sm:$0xff] }
 0x40c   : > { %v1414_v42 = vsub.f32 %v1382_v28, %v1398_v32  ;;  %3584 = vrsqrt.f32 %v1308_v33  ;;  %v1351_v43 = vmul.f32 %v3575_v35, %v1174_v30  ;;  %v4640_v47 = vpop.f32.mrb[19].mxu0  ;;  %v1391_v28 = vld [vmem:[#allocation11 + $0x58] sm:$0xff]  ;;  %v1183_v30 = vld [vmem:[#allocation9 + $0x68] sm:$0xff]  ;;  %v1182_v32 = vld [vmem:[#allocation9 + $0x60] sm:$0xff] }
 0x40d   : > { %1431 = vst.msk [vmem:[#allocation5 + $0x18] sm:$0xff] %vm1363_vm3, %v1415_v36  ;;  %3586 = vrsqrt.f32 %v1303_v37  ;;  %1369 = vst.msk [vmem:[#allocation4 + $0x28] sm:$0xff] %vm1363_vm3, %v1352_v38  ;;  %v1401_v40 = vmul.f32 %v4610_v45, %v1352_v38  ;;  %v3249_v49 = vpop.f32.mrb[16].mxu1  ;;  %v1393_v38 = vld [vmem:[#allocation11 + $0x68] sm:$0xff] }
 0x40e   : > { %v3577_v53 = vpop.eup %3576  ;;  %1430 = vst.msk [vmem:[#allocation5 + $0x10] sm:$0xff] %vm1363_vm3, %v1414_v42  ;;  %1368 = vst.msk [vmem:[#allocation4 + $0x20] sm:$0xff] %vm1363_vm3, %v1351_v43  ;;  %v1400_v54 = vmul.f32 %v1351_v43, %v4612_v46  ;;  %v1318_v55 = vadd.f32 1e-06, %v3249_v49  ;;  %v1312_v56 = vpop.f32.mrb[17].mxu1  ;;  %v1392_v43 = vld [vmem:[#allocation11 + $0x60] sm:$0xff] }
 0x40f   : > { %v3579_v58 = vpop.eup %3578  ;;  %v1417_v60 = vsub.f32 %v1385_v39, %v1401_v40  ;;  %v1313_v61 = vadd.f32 1e-06, %v1312_v56  ;;  %v1354_v62 = vmul.f32 %v3577_v53, %v1177_v44  ;;  %v1185_v39 = vld [vmem:[#allocation9 + $0x78] sm:$0xff]  ;;  %v1184_v44 = vld [vmem:[#allocation9 + $0x70] sm:$0xff] }
 0x410   : > { %v1416_v63 = vsub.f32 %v1384_v48, %v1400_v54  ;;  %3588 = vrsqrt.f32 %v1318_v55  ;;  %v1353_v45 = vmul.f32 %v3579_v58, %v1176_v50  ;;  %v1395_v54 = vld [vmem:[#allocation11 + $0x78] sm:$0xff]  ;;  %v1394_v56 = vld [vmem:[#allocation11 + $0x70] sm:$0xff] }
 0x411   : > { %1433 = vst.msk [vmem:[#allocation5 + $0x28] sm:$0xff] %vm1363_vm3, %v1417_v60  ;;  %3590 = vrsqrt.f32 %v1313_v61  ;;  %1371 = vst.msk [vmem:[#allocation4 + $0x38] sm:$0xff] %vm1363_vm3, %v1354_v62  ;;  %v1403_v2 = vmul.f32 %v4614_v51, %v1354_v62  ;;  %v3252_v46 = vpop.f32.mrb[18].mxu1 }
 0x412   : > { %v3581_v6 = vpop.eup %3580  ;;  %1432 = vst.msk [vmem:[#allocation5 + $0x20] sm:$0xff] %vm1363_vm3, %v1416_v63  ;;  %1370 = vst.msk [vmem:[#allocation4 + $0x30] sm:$0xff] %vm1363_vm3, %v1353_v45  ;;  %v1402_v7 = vmul.f32 %v1353_v45, %v4616_v52  ;;  %v1328_v9 = vadd.f32 1e-06, %v3252_v46  ;;  %v1322_v10 = vpop.f32.mrb[19].mxu1  ;;  %v1180_v52 = vld [vmem:[#allocation9 + $0x50] sm:$0xff] }
 0x413   : > { %v3583_v11 = vpop.eup %3582  ;;  %v1419_v12 = vsub.f32 %v1387_v0, %v1403_v2  ;;  %v1323_v13 = vadd.f32 1e-06, %v1322_v10  ;;  %v1356_v14 = vmul.f32 %v3581_v6, %v1179_v1 }
 0x414   : > { %v1418_v15 = vsub.f32 %v1386_v3, %v1402_v7  ;;  %3592 = vrsqrt.f32 %v1328_v9  ;;  %v1355_v51 = vmul.f32 %v3583_v11, %v1178_v5 }
 0x415   : > { %1435 = vst.msk [vmem:[#allocation5 + $0x38] sm:$0xff] %vm1363_vm3, %v1419_v12  ;;  %3594 = vrsqrt.f32 %v1323_v13  ;;  %1373 = vst.msk [vmem:[#allocation4 + $0x48] sm:$0xff] %vm1363_vm3, %v1356_v14  ;;  %v1405_v18 = vmul.f32 %v4618_v57, %v1356_v14 }
 0x416   : > { %v3585_v20 = vpop.eup %3584  ;;  %1434 = vst.msk [vmem:[#allocation5 + $0x30] sm:$0xff] %vm1363_vm3, %v1418_v15  ;;  %1372 = vst.msk [vmem:[#allocation4 + $0x40] sm:$0xff] %vm1363_vm3, %v1355_v51  ;;  %v1404_v22 = vmul.f32 %v1355_v51, %v4620_v59 }
 0x417   : > { %v3587_v23 = vpop.eup %3586  ;;  %v1421_v24 = vsub.f32 %v1389_v16, %v1405_v18  ;;  %v1358_v25 = vmul.f32 %v3585_v20, %v1181_v17 }
 0x418   : > { %v1420_v27 = vsub.f32 %v1388_v19, %v1404_v22  ;;  %v1357_v29 = vmul.f32 %v3587_v23, %v1180_v52 }
 0x419   : > { %1437 = vst.msk [vmem:[#allocation5 + $0x48] sm:$0xff] %vm1363_vm3, %v1421_v24  ;;  %1375 = vst.msk [vmem:[#allocation4 + $0x58] sm:$0xff] %vm1363_vm3, %v1358_v25  ;;  %v1407_v57 = vmul.f32 %v4622_v4, %v1358_v25 }
 0x41a   : > { %v3589_v33 = vpop.eup %3588  ;;  %1436 = vst.msk [vmem:[#allocation5 + $0x40] sm:$0xff] %vm1363_vm3, %v1420_v27  ;;  %1374 = vst.msk [vmem:[#allocation4 + $0x50] sm:$0xff] %vm1363_vm3, %v1357_v29  ;;  %v1406_v59 = vmul.f32 %v1357_v29, %v4624_v8 }
 0x41b   : > { %v3591_v34 = vpop.eup %3590  ;;  %v1423_v35 = vsub.f32 %v1391_v28, %v1407_v57  ;;  %v1360_v36 = vmul.f32 %v3589_v33, %v1183_v30 }
 0x41c   : > { %v1422_v37 = vsub.f32 %v1390_v31, %v1406_v59  ;;  %v1359_v42 = vmul.f32 %v3591_v34, %v1182_v32 }
 0x41d   : > { %1439 = vst.msk [vmem:[#allocation5 + $0x58] sm:$0xff] %vm1363_vm3, %v1423_v35  ;;  %1377 = vst.msk [vmem:[#allocation4 + $0x68] sm:$0xff] %vm1363_vm3, %v1360_v36  ;;  %v1409_v4 = vmul.f32 %v4628_v21, %v1360_v36 }
 0x41e   : > { %v3593_v40 = vpop.eup %3592  ;;  %1438 = vst.msk [vmem:[#allocation5 + $0x50] sm:$0xff] %vm1363_vm3, %v1422_v37  ;;  %1376 = vst.msk [vmem:[#allocation4 + $0x60] sm:$0xff] %vm1363_vm3, %v1359_v42  ;;  %v1408_v8 = vmul.f32 %v1359_v42, %v4630_v26 }
 0x41f   : > { %v3595_v48 = vpop.eup %3594  ;;  %v1425_v49 = vsub.f32 %v1393_v38, %v1409_v4  ;;  %v1362_v50 = vmul.f32 %v3593_v40, %v1185_v39 }
 0x420   : > { %v1424_v53 = vsub.f32 %v1392_v43, %v1408_v8  ;;  %v1361_v55 = vmul.f32 %v3595_v48, %v1184_v44 }
 0x421   : > { %1441 = vst.msk [vmem:[#allocation5 + $0x68] sm:$0xff] %vm1363_vm3, %v1425_v49  ;;  %1379 = vst.msk [vmem:[#allocation4 + $0x78] sm:$0xff] %vm1363_vm3, %v1362_v50  ;;  %v1411_v21 = vmul.f32 %v4638_v41, %v1362_v50 }
 0x422   : > { %1440 = vst.msk [vmem:[#allocation5 + $0x60] sm:$0xff] %vm1363_vm3, %v1424_v53  ;;  %1378 = vst.msk [vmem:[#allocation4 + $0x70] sm:$0xff] %vm1363_vm3, %v1361_v55  ;;  %v1410_v58 = vmul.f32 %v1361_v55, %v4640_v47 }
 0x423   : > { %v1427_v26 = vsub.f32 %v1395_v54, %v1411_v21 }
 0x424   : > { %v1426_v60 = vsub.f32 %v1394_v56, %v1410_v58 }
 0x425   : > { %1443 = vst.msk [vmem:[#allocation5 + $0x78] sm:$0xff] %vm1363_vm3, %v1427_v26 }
 0x426   : > { %1442 = vst.msk [vmem:[#allocation5 + $0x70] sm:$0xff] %vm1363_vm3, %v1426_v60 }
 0x427 PF: > { %s5049_s28 = sld [smem:[#allocation32_spill]] }
 0x42d   : > { %p2742_p12 = scmp.ne.s32.totalorder %s5049_s28, 1 }
 0x42e   : > { %v1576_v61 = vld [vmem:[#allocation5] sm:$0xff] (!%p2742_p12)  ;;  %v4053_v41 = vmov (!%p2742_p12), 0   ;;  %v1466_v47 = vld [vmem:[#allocation4 + $0x10] sm:$0xff] (!%p2742_p12)  ;;  %v1465_v63 = vld [vmem:[#allocation4 + $0x8] sm:$0xff] (!%p2742_p12) }
 0x42f   : > { %1447 = sbr.rel (%p2742_p12) target bundleno = 1748 (0x6d4), region = 92  ;;  %v1464_v62 = vld [vmem:[#allocation4] sm:$0xff] (!%p2742_p12)  ;;  %3597 = vset.pattern.permute.xlu1 (!%p2742_p12), %v4053_v41  ;;  %3596 = vset.pattern.permute.xlu0 (!%p2742_p12), %v4053_v41  ;;  %v1467_v0 = vld [vmem:[#allocation4 + $0x18] sm:$0xff] (!%p2742_p12)  ;;  %v1577_v45 = vld [vmem:[#allocation5 + $0x8] sm:$0xff] (!%p2742_p12) }
 0x430   : > { %1594 = vperm.xlu1 (!%p2742_p12), %3597, %v1576_v61   ;;  %1482 = vperm.xlu0 (!%p2742_p12), %3596, %v1464_v62   ;;  %v1468_v1 = vld [vmem:[#allocation4 + $0x20] sm:$0xff] (!%p2742_p12)  ;;  %v1578_v2 = vld [vmem:[#allocation5 + $0x10] sm:$0xff] (!%p2742_p12)  ;;  %v1469_v3 = vld [vmem:[#allocation4 + $0x28] sm:$0xff] (!%p2742_p12) }
 0x431   : > { %1937 = vmatprep.mubr.bf16.mxu0 (!%p2742_p12), %v4053_v41  ;;  %v1579_v46 = vld [vmem:[#allocation5 + $0x18] sm:$0xff] (!%p2742_p12)  ;;  %v1470_v5 = vld [vmem:[#allocation4 + $0x30] sm:$0xff] (!%p2742_p12)  ;;  %v1580_v6 = vld [vmem:[#allocation5 + $0x20] sm:$0xff] (!%p2742_p12) }
 0x432   : > { %v1471_v7 = vld [vmem:[#allocation4 + $0x38] sm:$0xff] (!%p2742_p12)  ;;  %v1581_v9 = vld [vmem:[#allocation5 + $0x28] sm:$0xff] (!%p2742_p12)  ;;  %v1472_v10 = vld [vmem:[#allocation4 + $0x40] sm:$0xff] (!%p2742_p12) }
 0x433   : > { %v1582_v11 = vld [vmem:[#allocation5 + $0x30] sm:$0xff] (!%p2742_p12)  ;;  %v1473_v12 = vld [vmem:[#allocation4 + $0x48] sm:$0xff] (!%p2742_p12)  ;;  %v1583_v13 = vld [vmem:[#allocation5 + $0x38] sm:$0xff] (!%p2742_p12) }
 0x434   : > { %1492 = vperm.xlu1 (!%p2742_p12), %3597, %v1466_v47   ;;  %1487 = vperm.xlu0 (!%p2742_p12), %3596, %v1465_v63   ;;  %v1474_v14 = vld [vmem:[#allocation4 + $0x50] sm:$0xff] (!%p2742_p12)  ;;  %v1584_v15 = vld [vmem:[#allocation5 + $0x40] sm:$0xff] (!%p2742_p12)  ;;  %v1475_v16 = vld [vmem:[#allocation4 + $0x58] sm:$0xff] (!%p2742_p12) }
 0x435   : > { %v1585_v51 = vld [vmem:[#allocation5 + $0x48] sm:$0xff] (!%p2742_p12)  ;;  %v1476_v17 = vld [vmem:[#allocation4 + $0x60] sm:$0xff] (!%p2742_p12)  ;;  %v1586_v18 = vld [vmem:[#allocation5 + $0x50] sm:$0xff] (!%p2742_p12) }
 0x436   : > { %v1477_v19 = vld [vmem:[#allocation4 + $0x68] sm:$0xff]  ;;  %v1587_v52 = vld [vmem:[#allocation5 + $0x58] sm:$0xff]  ;;  %v1478_v20 = vld [vmem:[#allocation4 + $0x70] sm:$0xff] }
 0x437   : > { %v1588_v22 = vld [vmem:[#allocation5 + $0x60] sm:$0xff]  ;;  %v1479_v23 = vld [vmem:[#allocation4 + $0x78] sm:$0xff]  ;;  %v1589_v24 = vld [vmem:[#allocation5 + $0x68] sm:$0xff] }
 0x438   : > { %1497 = vperm.xlu1 %3597, %v1467_v0   ;;  %1599 = vperm.xlu0 %3596, %v1577_v45   ;;  %v1591_v25 = vld [vmem:[#allocation5 + $0x78] sm:$0xff]  ;;  %v1590_v27 = vld [vmem:[#allocation5 + $0x70] sm:$0xff]  ;;  %v3600_v29 = vld [vmem:[#allocation15] ss:$12 sps:$4 sm:$0xff]  }
 0x439   : > { %v3598_v28 = vld [vmem:[#allocation15 + $0x4] ss:$12 sps:$4 sm:$0xff]   ;;  %v3601_v30 = vld [vmem:[#allocation15 + $0x1c] ss:$12 sps:$4 sm:$0xff]   ;;  %v3610_v31 = vld [vmem:[#allocation15 + $0x20] ss:$12 sps:$4 sm:$0xff]  }
 0x43a   : > { %v3606_v57 = vld [vmem:[#allocation15 + $0x8] ss:$12 sps:$4 sm:$0xff]   ;;  %1905 = vmatprep.subr.bf16.mxu0 %v3598_v28  ;;  %v3603_v32 = vld [vmem:[#allocation15 + $0x18] ss:$12 sps:$4 sm:$0xff]   ;;  %v3607_v34 = vld [vmem:[#allocation15 + $0x30] ss:$12 sps:$4 sm:$0xff]  }
 0x43b   : > { %1906 = vmatpush1.bf16.msra.mxu0 %v3600_v29  ;;  %3253 = vmatprep.subr.bf16.mxu1 %v3606_v57  ;;  %v3604_v33 = vld [vmem:[#allocation15 + $0x34] ss:$12 sps:$4 sm:$0xff]   ;;  %v3614_v59 = vld [vmem:[#allocation15 + $0x38] ss:$12 sps:$4 sm:$0xff]   ;;  %v3618_v36 = vld [vmem:[#allocation15 + $0x50] ss:$12 sps:$4 sm:$0xff]  }
 0x43c   : > { %1502 = vperm.xlu1 %3597, %v1468_v1   ;;  %1604 = vperm.xlu0 %3596, %v1578_v2   ;;  %v3608_v35 = vld [vmem:[#allocation15 + $0x4c] ss:$12 sps:$4 sm:$0xff]   ;;  %v3611_v37 = vld [vmem:[#allocation15 + $0x48] ss:$12 sps:$4 sm:$0xff]   ;;  %v3612_v38 = vld [vmem:[#allocation15 + $0x64] ss:$12 sps:$4 sm:$0xff]  }
 0x43d   : > { %1907 = vmatprep.subr.bf16.mxu0 %v3601_v30  ;;  %3254 = vmatpush3.bf16.msra.mxu1 %v3606_v57  ;;  %v3622_v42 = vld [vmem:[#allocation15 + $0x68] ss:$12 sps:$4 sm:$0xff]   ;;  %v3615_v39 = vld [vmem:[#allocation15 + $0x60] ss:$12 sps:$4 sm:$0xff]   ;;  %v3619_v43 = vld [vmem:[#allocation15 + $0x78] ss:$12 sps:$4 sm:$0xff]  }
 0x43e   : > { %3255 = vmatprep.subr.bf16.mxu1 %v3610_v31  ;;  %v3616_v4 = vld [vmem:[#allocation15 + $0x7c] ss:$12 sps:$4 sm:$0xff]   ;;  %v3620_v44 = vld [vmem:[#allocation15 + $0x94] ss:$12 sps:$4 sm:$0xff]   ;;  %v3624_v58 = vld [vmem:[#allocation15 + $0xac] ss:$12 sps:$4 sm:$0xff]  }
 0x43f   : > { %1908 = vmatpush1.bf16.msra.mxu0 %v3603_v32  ;;  %v3623_v40 = vld [vmem:[#allocation15 + $0x90] ss:$12 sps:$4 sm:$0xff]   ;;  %v1448_v8 = vld [vmem:[%s4459_s5] sm:$0xff]  ;;  %v1449_v21 = vld [vmem:[%s4459_s5 + $0x8] sm:$0xff] }
 0x440   : > { %1507 = vperm.xlu1 %3597, %v1469_v3   ;;  %1609 = vperm.xlu0 %3596, %v1579_v46   ;;  %v3626_v26 = vld [vmem:[#allocation15 + $0x80] ss:$12 sps:$4 sm:$0xff]   ;;  %v3627_v60 = vld [vmem:[#allocation15 + $0xa8] ss:$12 sps:$4 sm:$0xff]   ;;  %v1451_v45 = vld [vmem:[%s4459_s5 + $0x18] sm:$0xff] }
 0x441   : > { %1909 = vmatprep.subr.bf16.mxu0 %v3604_v33  ;;  %3256 = vmatpush3.bf16.msra.mxu1 %v3610_v31  ;;  %v1450_v61 = vld [vmem:[%s4459_s5 + $0x10] sm:$0xff]  ;;  %v3628_v3 = vld [vmem:[#allocation15 + $0x98] ss:$12 sps:$4 sm:$0xff]   ;;  %v1457_v32 = vld [vmem:[%s4459_s5 + $0x48] sm:$0xff] }
 0x442   : > { %3257 = vmatprep.subr.bf16.mxu1 %v3614_v59  ;;  %v1456_v28 = vld [vmem:[%s4459_s5 + $0x40] sm:$0xff] }
 0x443   : > { %1910 = vmatpush1.bf16.msra.mxu0 %v3607_v34 }
 0x444   : > { %1512 = vperm.xlu1 %3597, %v1470_v5   ;;  %1614 = vperm.xlu0 %3596, %v1580_v6   ;;  %v3629_v6 = vld [vmem:[#allocation15 + $0xb0] ss:$12 sps:$4 sm:$0xff]  }
 0x445   : > { %1911 = vmatprep.subr.bf16.mxu0 %v3608_v35  ;;  %3258 = vmatpush3.bf16.msra.mxu1 %v3614_v59 }
 0x446   : > { %3259 = vmatprep.subr.bf16.mxu1 %v3618_v36 }
 0x447   : > { %1912 = vmatpush1.bf16.msra.mxu0 %v3611_v37 }
 0x448   : > { %1517 = vperm.xlu1 %3597, %v1471_v7   ;;  %1619 = vperm.xlu0 %3596, %v1581_v9   ;;  %v1452_v7 = vld [vmem:[%s4459_s5 + $0x20] sm:$0xff] }
 0x449   : > { %1913 = vmatprep.subr.bf16.mxu0 %v3612_v38  ;;  %3260 = vmatpush3.bf16.msra.mxu1 %v3618_v36  ;;  %v1458_v36 = vld [vmem:[%s4459_s5 + $0x50] sm:$0xff] }
 0x44a   : > { %3261 = vmatprep.subr.bf16.mxu1 %v3622_v42 }
 0x44b   : > { %1914 = vmatpush1.bf16.msra.mxu0 %v3615_v39 }
 0x44c   : > { %1522 = vperm.xlu1 %3597, %v1472_v10   ;;  %1624 = vperm.xlu0 %3596, %v1582_v11  }
 0x44d   : > { %1915 = vmatprep.subr.bf16.mxu0 %v3616_v4  ;;  %3262 = vmatpush3.bf16.msra.mxu1 %v3622_v42  ;;  %v1459_v4 = vld [vmem:[%s4459_s5 + $0x58] sm:$0xff] }
 0x44e   : > { %3263 = vmatprep.subr.bf16.mxu1 %v3626_v26 }
 0x44f   : > { %1916 = vmatpush1.bf16.msra.mxu0 %v3619_v43 }
 0x450   : > { %1527 = vperm.xlu1 %3597, %v1473_v12   ;;  %1629 = vperm.xlu0 %3596, %v1583_v13   ;;  %v1453_v13 = vld [vmem:[%s4459_s5 + $0x28] sm:$0xff] }
 0x451   : > { %1917 = vmatprep.subr.bf16.mxu0 %v3620_v44  ;;  %3264 = vmatpush3.bf16.msra.mxu1 %v3626_v26 }
 0x452   : > { %3265 = vmatprep.subr.bf16.mxu1 %v3628_v3 }
 0x453   : > { %1918 = vmatpush1.bf16.msra.mxu0 %v3623_v40 }
 0x454   : > { %1532 = vperm.xlu1 %3597, %v1474_v14   ;;  %1634 = vperm.xlu0 %3596, %v1584_v15  }
 0x455   : > { %1919 = vmatprep.subr.bf16.mxu0 %v3624_v58  ;;  %3266 = vmatpush3.bf16.msra.mxu1 %v3628_v3 }
 0x456   : > { %3267 = vmatprep.subr.bf16.mxu1 %v3629_v6 }
 0x457   : > { %1920 = vmatpush1.bf16.msra.mxu0 %v3627_v60  ;;  %v1462_v60 = vld [vmem:[%s4459_s5 + $0x70] sm:$0xff] }
 0x458   : > { %1537 = vperm.xlu1 %3597, %v1475_v16   ;;  %1639 = vperm.xlu0 %3596, %v1585_v51  }
 0x459   : > { %3268 = vmatpush3.bf16.msra.mxu1 %v3629_v6 }
 0x45c   : > { %1542 = vperm.xlu1 %3597, %v1476_v17   ;;  %1644 = vperm.xlu0 %3596, %v1586_v18   ;;  %v1454_v17 = vld [vmem:[%s4459_s5 + $0x30] sm:$0xff] }
 0x460   : > { %1547 = vperm.xlu1 %3597, %v1477_v19   ;;  %1649 = vperm.xlu0 %3596, %v1587_v52  }
 0x464   : > { %1552 = vperm.xlu1 %3597, %v1478_v20   ;;  %1654 = vperm.xlu0 %3596, %v1588_v22   ;;  %v1455_v22 = vld [vmem:[%s4459_s5 + $0x38] sm:$0xff] }
 0x468   : > { %1557 = vperm.xlu1 %3597, %v1479_v23   ;;  %1659 = vperm.xlu0 %3596, %v1589_v24  }
 0x46c   : > { %1669 = vperm.xlu1 %3597, %v1591_v25   ;;  %1664 = vperm.xlu0 %3596, %v1590_v27  }
 0x4af   : > { %v1595_v48 = vpop.permute.xlu1 %1594  ;;  %v1483_v49 = vpop.permute.xlu0 %1482 }
 0x4b0   : > { %v1560_v50 = vmul.f32 %v1483_v49, %v1448_v8 }
 0x4b2   : > { %v1672_v53 = vadd.f32 %v1595_v48, %v1560_v50  ;;  %v1460_v48 = vld [vmem:[%s4459_s5 + $0x60] sm:$0xff] }
 0x4b3   : > { %v1493_v54 = vpop.permute.xlu1 %1492  ;;  %v1488_v55 = vpop.permute.xlu0 %1487 }
 0x4b4   : > { %1688 = vxpose.xlu0.b32.start [1/16] %v1672_v53, 128  ;;  %v1561_v56 = vmul.f32 %v1488_v55, %v1449_v21  ;;  %v1562_v0 = vmul.f32 %v1493_v54, %v1450_v61  ;;  %v1461_v55 = vld [vmem:[%s4459_s5 + $0x68] sm:$0xff] }
 0x4b7   : > { %v1498_v62 = vpop.permute.xlu1 %1497  ;;  %v1600_v47 = vpop.permute.xlu0 %1599 }
 0x4b8   : > { %v1673_v63 = vadd.f32 %v1600_v47, %v1561_v56  ;;  %v1563_v5 = vmul.f32 %v1498_v62, %v1451_v45 }
 0x4ba   : > { %1689 = vxpose.xlu0.b32.cont [2/16] %v1673_v63, 128 }
 0x4bb   : > { %v1503_v1 = vpop.permute.xlu1 %1502  ;;  %v1605_v2 = vpop.permute.xlu0 %1604 }
 0x4bc   : > { %v1674_v46 = vadd.f32 %v1605_v2, %v1562_v0  ;;  %v1564_v12 = vmul.f32 %v1503_v1, %v1452_v7  ;;  %v1463_v0 = vld [vmem:[%s4459_s5 + $0x78] sm:$0xff] }
 0x4be   : > { %1690 = vxpose.xlu0.b32.cont [3/16] %v1674_v46, 128 }
 0x4bf   : > { %v1508_v9 = vpop.permute.xlu1 %1507  ;;  %v1610_v10 = vpop.permute.xlu0 %1609 }
 0x4c0   : > { %v1675_v11 = vadd.f32 %v1610_v10, %v1563_v5  ;;  %v1565_v51 = vmul.f32 %v1508_v9, %v1453_v13 }
 0x4c2   : > { %1691 = vxpose.xlu0.b32.cont [4/16] %v1675_v11, 128 }
 0x4c3   : > { %v1513_v14 = vpop.permute.xlu1 %1512  ;;  %v1615_v15 = vpop.permute.xlu0 %1614 }
 0x4c4   : > { %v1676_v16 = vadd.f32 %v1615_v15, %v1564_v12  ;;  %v1566_v20 = vmul.f32 %v1513_v14, %v1454_v17 }
 0x4c6   : > { %1692 = vxpose.xlu0.b32.cont [5/16] %v1676_v16, 128 }
 0x4c7   : > { %v1518_v18 = vpop.permute.xlu1 %1517  ;;  %v1620_v19 = vpop.permute.xlu0 %1619 }
 0x4c8   : > { %v1677_v52 = vadd.f32 %v1620_v19, %v1565_v51  ;;  %v1567_v27 = vmul.f32 %v1518_v18, %v1455_v22 }
 0x4ca   : > { %1693 = vxpose.xlu0.b32.cont [6/16] %v1677_v52, 128 }
 0x4cb   : > { %v1523_v23 = vpop.permute.xlu1 %1522  ;;  %v1625_v24 = vpop.permute.xlu0 %1624 }
 0x4cc   : > { %v1678_v25 = vadd.f32 %v1625_v24, %v1566_v20  ;;  %v1568_v31 = vmul.f32 %v1523_v23, %v1456_v28 }
 0x4ce   : > { %1694 = vxpose.xlu0.b32.cont [7/16] %v1678_v25, 128 }
 0x4cf   : > { %v1528_v29 = vpop.permute.xlu1 %1527  ;;  %v1630_v30 = vpop.permute.xlu0 %1629 }
 0x4d0   : > { %v1679_v57 = vadd.f32 %v1630_v30, %v1567_v27  ;;  %v1569_v35 = vmul.f32 %v1528_v29, %v1457_v32  ;;  %v1762_v30 = vlaneseq  ;;  %v1760_v32 = vld [vmem:[#allocation17] sm:$0x7] }
 0x4d2   : > { %1695 = vxpose.xlu0.b32.cont [8/16] %v1679_v57, 128  ;;  %v1763_v57 = vshrl.u32 %v1762_v30, 7 }
 0x4d3   : > { %v1533_v33 = vpop.permute.xlu1 %1532  ;;  %v1635_v59 = vpop.permute.xlu0 %1634 }
 0x4d4   : > { %v1680_v34 = vadd.f32 %v1635_v59, %v1568_v31  ;;  %v1570_v39 = vmul.f32 %v1533_v33, %v1458_v36  ;;  %v1764_v31 = vsub.s32 0, %v1763_v57  ;;  %v1768_v33 = vsub.s32 1, %v1763_v57 }
 0x4d6   : > { %1696 = vxpose.xlu0.b32.cont [9/16] %v1680_v34, 128  ;;  %v4707_v59 = vrot.slane %v1760_v32, %v1764_v31  ;;  %v4709_v34 = vrot.slane %v1760_v32, %v1768_v33 }
 0x4d7   : > { %v1538_v37 = vpop.permute.xlu1 %1537  ;;  %v1640_v38 = vpop.permute.xlu0 %1639 }
 0x4d8   : > { %v1681_v42 = vadd.f32 %v1640_v38, %v1569_v35  ;;  %v1571_v8 = vmul.f32 %v1538_v37, %v1459_v4  ;;  %v1772_v4 = vsub.s32 2, %v1763_v57 }
 0x4da   : > { %1697 = vxpose.xlu0.b32.cont [10/16] %v1681_v42, 128 }
 0x4db   : > { %v1543_v43 = vpop.permute.xlu1 %1542  ;;  %v1645_v44 = vpop.permute.xlu0 %1644 }
 0x4dc   : > { %v1682_v40 = vadd.f32 %v1645_v44, %v1570_v39  ;;  %v1572_v54 = vmul.f32 %v1543_v43, %v1460_v48  ;;  %v4715_v48 = vrot.slane %v1760_v32, %v1772_v4 }
 0x4de   : > { %1698 = vxpose.xlu0.b32.cont [11/16] %v1682_v40, 128 }
 0x4df   : > { %v1548_v49 = vpop.permute.xlu1 %1547  ;;  %v1650_v50 = vpop.permute.xlu0 %1649 }
 0x4e0   : > { %v1683_v53 = vadd.f32 %v1650_v50, %v1571_v8  ;;  %v1573_v26 = vmul.f32 %v1548_v49, %v1461_v55 }
 0x4e2   : > { %1699 = vxpose.xlu0.b32.cont [12/16] %v1683_v53, 128 }
 0x4e3   : > { %v1553_v21 = vpop.permute.xlu1 %1552  ;;  %v1655_v56 = vpop.permute.xlu0 %1654 }
 0x4e4   : > { %v1684_v58 = vadd.f32 %v1655_v56, %v1572_v54  ;;  %v1574_v63 = vmul.f32 %v1553_v21, %v1462_v60 }
 0x4e6   : > { %1700 = vxpose.xlu0.b32.cont [13/16] %v1684_v58, 128 }
 0x4e7   : > { %v1558_v61 = vpop.permute.xlu1 %1557  ;;  %v1660_v62 = vpop.permute.xlu0 %1659 }
 0x4e8   : > { %v1685_v47 = vadd.f32 %v1660_v62, %v1573_v26  ;;  %v1575_v3 = vmul.f32 %v1558_v61, %v1463_v0 }
 0x4ea   : > { %1701 = vxpose.xlu0.b32.cont [14/16] %v1685_v47, 128 }
 0x4eb   : > { %v1665_v45 = vpop.permute.xlu0 %1664  ;;  %v1670_v2 = vpop.permute.xlu1 %1669 }
 0x4ec   : > { %v1686_v1 = vadd.f32 %v1665_v45, %v1574_v63  ;;  %v1687_v46 = vadd.f32 %v1670_v2, %v1575_v3 }
 0x4ee   : > { %1702 = vxpose.xlu0.b32.cont [15/16] %v1686_v1, 128 }
 0x4f2   : > { %1703 = vxpose.xlu0.b32.end [16/16] %v1687_v46, 128 }
 0x536   : > { %v1704_v5 = vpop.trf.xlu0 }
 0x53a   : > { %v1705_v6 = vpop.trf.xlu0 }
 0x53b   : > { %v1720_v7 = vpack.c.bf16 %v1705_v6, %v1704_v5 }
 0x53d   : > { %1938 = vmatmul.mubr.bf16.vlgmr.msra.gmra.mrb[0].mxu0 %v1720_v7  ;;  %3269 = vmatprep.mubr.bf16.mxu1 %v1720_v7 }
 0x53e   : > { %v1706_v9 = vpop.trf.xlu0  ;;  %1947 = vmatprep.mubr.bf16.mxu0 %v4053_v41 }
 0x542   : > { %v1707_v10 = vpop.trf.xlu0 }
 0x543   : > { %v1721_v11 = vpack.c.bf16 %v1707_v10, %v1706_v9 }
 0x545   : > { %1948 = vmatmul.mubr.bf16.gmra.mrb[4].mxu0 %v1721_v11  ;;  %3270 = vmatmul.mubr.bf16.vlgmr.msra.gmra.mrb[0].mxu1 %v1721_v11 }
 0x546   : > { %v1708_v12 = vpop.trf.xlu0  ;;  %1957 = vmatprep.mubr.bf16.mxu0 %v4053_v41 }
 0x54a   : > { %v1709_v13 = vpop.trf.xlu0 }
 0x54b   : > { %v1722_v14 = vpack.c.bf16 %v1709_v13, %v1708_v12 }
 0x54d   : > { %1958 = vmatmul.mubr.bf16.gmra.mrb[8].mxu0 %v1722_v14  ;;  %3273 = vmatprep.mubr.bf16.mxu1 %v1722_v14 }
 0x54e   : > { %v1710_v15 = vpop.trf.xlu0  ;;  %1967 = vmatprep.mubr.bf16.mxu0 %v4053_v41 }
 0x552   : > { %v1711_v16 = vpop.trf.xlu0 }
 0x553   : > { %v1723_v51 = vpack.c.bf16 %v1711_v16, %v1710_v15 }
 0x555   : > { %1968 = vmatmul.mubr.bf16.gmra.mrb[12].mxu0 %v1723_v51  ;;  %3274 = vmatmul.mubr.bf16.gmra.mrb[4].mxu1 %v1723_v51 }
 0x556   : > { %v1712_v17 = vpop.trf.xlu0  ;;  %1977 = vmatprep.mubr.bf16.mxu0 %v4053_v41 }
 0x55a   : > { %v1713_v18 = vpop.trf.xlu0 }
 0x55b   : > { %v1724_v19 = vpack.c.bf16 %v1713_v18, %v1712_v17 }
 0x55d   : > { %1978 = vmatmul.mubr.bf16.gmra.mrb[16].mxu0 %v1724_v19  ;;  %3277 = vmatprep.mubr.bf16.mxu1 %v1724_v19 }
 0x55e   : > { %v1714_v52 = vpop.trf.xlu0  ;;  %1987 = vmatprep.mubr.bf16.mxu0 %v4053_v41 }
 0x562   : > { %v1715_v20 = vpop.trf.xlu0 }
 0x563   : > { %v1725_v22 = vpack.c.bf16 %v1715_v20, %v1714_v52 }
 0x565   : > { %1988 = vmatmul.mubr.bf16.gmra.mrb[20].mxu0 %v1725_v22  ;;  %3278 = vmatmul.mubr.bf16.gmra.mrb[8].mxu1 %v1725_v22 }
 0x566   : > { %v1716_v23 = vpop.trf.xlu0  ;;  %1997 = vmatprep.mubr.bf16.mxu0 %v4053_v41 }
 0x56a   : > { %v1717_v24 = vpop.trf.xlu0 }
 0x56b   : > { %v1726_v25 = vpack.c.bf16 %v1717_v24, %v1716_v23 }
 0x56d   : > { %1998 = vmatmul.mubr.bf16.gmra.mrb[24].mxu0 %v1726_v25  ;;  %3281 = vmatprep.mubr.bf16.mxu1 %v1726_v25 }
 0x56e   : > { %v1718_v27 = vpop.trf.xlu0  ;;  %2007 = vmatprep.mubr.bf16.mxu0 %v4053_v41 }
 0x572   : > { %v1719_v28 = vpop.trf.xlu0 }
 0x573   : > { %v1727_v29 = vpack.c.bf16 %v1719_v28, %v1718_v27 }
 0x575   : > { %2008 = vmatmul.mubr.bf16.gmra.mrb[28].mxu0 %v1727_v29  ;;  %3282 = vmatmul.mubr.bf16.gmra.mrb[12].mxu1 %v1727_v29 }
 0x610   : > { %v1939_v35 = vpop.f32.mrb[0].mxu0 }
 0x611   : > { %v1940_v36 = vadd.f32 %v1939_v35, %v4707_v59  ;;  %v1941_v37 = vpop.f32.mrb[1].mxu0 }
 0x612   : > { %v1942_v41 = vadd.f32 %v1941_v37, %v4709_v34  ;;  %v1943_v38 = vpop.f32.mrb[2].mxu0 }
 0x613   : > { %v1944_v42 = vadd.f32 %v1943_v38, %v4707_v59  ;;  %v1945_v39 = vpop.f32.mrb[3].mxu0  ;;  %v2115_v43 = vmul.f32 0.088388346, %v1940_v36 }
 0x614   : > { %2211 = vxpose.xlu1.b32.start [1/16] %v1942_v41, 128  ;;  %v1946_v40 = vadd.f32 %v1945_v39, %v4709_v34 }
 0x615   : > { %v2116_v44 = vmul.f32 0.088388346, %v1944_v42 }
 0x617   : > { %v2879_v8 = vpack.c.bf16 %v2116_v44, %v2115_v43 }
 0x618   : > { %2212 = vxpose.xlu1.b32.cont [2/16] %v1946_v40, 128  ;;  %v1949_v49 = vpop.f32.mrb[4].mxu0  ;;  %v3271_v50 = vpop.f32.mrb[0].mxu1 }
 0x619   : > { %2880 = vst [vmem:[%s4484_s12] sm:$0xff] %v2879_v8   ;;  %v1950_v53 = vadd.f32 %v1949_v49, %v4707_v59  ;;  %v1951_v54 = vpop.f32.mrb[5].mxu0  ;;  %v2052_v55 = vpop.f32.mrb[1].mxu1  ;;  %v2061_v26 = vadd.f32 %v3271_v50, %v4715_v48 }
 0x61a   : > { %v1952_v21 = vadd.f32 %v1951_v54, %v4709_v34  ;;  %v1953_v56 = vpop.f32.mrb[6].mxu0  ;;  %v3272_v58 = vpop.f32.mrb[2].mxu1  ;;  %v2053_v63 = vadd.f32 %v2052_v55, %v4715_v48 }
 0x61b   : > { %v1954_v60 = vadd.f32 %v1953_v56, %v4707_v59  ;;  %v2064_v61 = vadd.f32 %v3272_v58, %v4715_v48  ;;  %v1955_v62 = vpop.f32.mrb[7].mxu0  ;;  %v2055_v47 = vpop.f32.mrb[3].mxu1  ;;  %v2117_v45 = vmul.f32 0.088388346, %v1950_v53 }
 0x61c   : > { %v2056_v0 = vadd.f32 %v2055_v47, %v4715_v48  ;;  %2213 = vxpose.xlu1.b32.cont [3/16] %v1952_v21, 128  ;;  %v1956_v3 = vadd.f32 %v1955_v62, %v4709_v34 }
 0x61d   : > { %v2118_v1 = vmul.f32 0.088388346, %v1954_v60  ;;  %v2964_v2 = vpack.c.bf16 %v2064_v61, %v2061_v26 }
 0x61e   : > { %v2959_v46 = vpack.c.bf16 %v2056_v0, %v2053_v63 }
 0x61f   : > { %v2884_v5 = vpack.c.bf16 %v2118_v1, %v2117_v45  ;;  %3010 = vst [vmem:[%s4488_s0 + $0x8] sm:$0xff] %v2964_v2  }
 0x620   : > { %2960 = vst [vmem:[%s4488_s0] sm:$0xff] %v2959_v46   ;;  %2214 = vxpose.xlu1.b32.cont [4/16] %v1956_v3, 128  ;;  %v1959_v6 = vpop.f32.mrb[8].mxu0 }
 0x621   : > { %2996 = vst [vmem:[%s4484_s12 + $0x8] sm:$0xff] %v2884_v5   ;;  %v1960_v7 = vadd.f32 %v1959_v6, %v4707_v59  ;;  %v1961_v9 = vpop.f32.mrb[9].mxu0 }
 0x622   : > { %v1962_v10 = vadd.f32 %v1961_v9, %v4709_v34  ;;  %v1963_v11 = vpop.f32.mrb[10].mxu0 }
 0x623   : > { %v1964_v12 = vadd.f32 %v1963_v11, %v4707_v59  ;;  %v1965_v13 = vpop.f32.mrb[11].mxu0  ;;  %v2119_v14 = vmul.f32 0.088388346, %v1960_v7 }
 0x624   : > { %2215 = vxpose.xlu1.b32.cont [5/16] %v1962_v10, 128  ;;  %v1966_v16 = vadd.f32 %v1965_v13, %v4709_v34 }
 0x625   : > { %v2120_v15 = vmul.f32 0.088388346, %v1964_v12 }
 0x627   : > { %v2889_v51 = vpack.c.bf16 %v2120_v15, %v2119_v14 }
 0x628   : > { %2216 = vxpose.xlu1.b32.cont [6/16] %v1966_v16, 128  ;;  %v1969_v17 = vpop.f32.mrb[12].mxu0  ;;  %v3275_v18 = vpop.f32.mrb[4].mxu1 }
 0x629   : > { %2997 = vst [vmem:[%s4484_s12 + $0x10] sm:$0xff] %v2889_v51   ;;  %v1970_v19 = vadd.f32 %v1969_v17, %v4707_v59  ;;  %v1971_v52 = vpop.f32.mrb[13].mxu0  ;;  %v2068_v20 = vpop.f32.mrb[5].mxu1  ;;  %v2077_v25 = vadd.f32 %v3275_v18, %v4715_v48 }
 0x62a   : > { %v1972_v22 = vadd.f32 %v1971_v52, %v4709_v34  ;;  %v1973_v23 = vpop.f32.mrb[14].mxu0  ;;  %v3276_v24 = vpop.f32.mrb[6].mxu1  ;;  %v2069_v57 = vadd.f32 %v2068_v20, %v4715_v48 }
 0x62b   : > { %v1974_v27 = vadd.f32 %v1973_v23, %v4707_v59  ;;  %v2080_v28 = vadd.f32 %v3276_v24, %v4715_v48  ;;  %v1975_v29 = vpop.f32.mrb[15].mxu0  ;;  %v2071_v30 = vpop.f32.mrb[7].mxu1  ;;  %v2121_v32 = vmul.f32 0.088388346, %v1970_v19 }
 0x62c   : > { %v2072_v31 = vadd.f32 %v2071_v30, %v4715_v48  ;;  %2217 = vxpose.xlu1.b32.cont [7/16] %v1972_v22, 128  ;;  %v1976_v36 = vadd.f32 %v1975_v29, %v4709_v34 }
 0x62d   : > { %v2122_v33 = vmul.f32 0.088388346, %v1974_v27  ;;  %v2974_v35 = vpack.c.bf16 %v2080_v28, %v2077_v25 }
 0x62e   : > { %v2969_v37 = vpack.c.bf16 %v2072_v31, %v2069_v57 }
 0x62f   : > { %v2894_v41 = vpack.c.bf16 %v2122_v33, %v2121_v32  ;;  %3012 = vst [vmem:[%s4488_s0 + $0x18] sm:$0xff] %v2974_v35  }
 0x630   : > { %3011 = vst [vmem:[%s4488_s0 + $0x10] sm:$0xff] %v2969_v37   ;;  %2218 = vxpose.xlu1.b32.cont [8/16] %v1976_v36, 128  ;;  %v1979_v38 = vpop.f32.mrb[16].mxu0 }
 0x631   : > { %2998 = vst [vmem:[%s4484_s12 + $0x18] sm:$0xff] %v2894_v41   ;;  %v1980_v42 = vadd.f32 %v1979_v38, %v4707_v59  ;;  %v1981_v39 = vpop.f32.mrb[17].mxu0 }
 0x632   : > { %v1982_v4 = vadd.f32 %v1981_v39, %v4709_v34  ;;  %v1983_v43 = vpop.f32.mrb[18].mxu0 }
 0x633   : > { %v1984_v44 = vadd.f32 %v1983_v43, %v4707_v59  ;;  %v1985_v40 = vpop.f32.mrb[19].mxu0  ;;  %v2123_v8 = vmul.f32 0.088388346, %v1980_v42 }
 0x634   : > { %2219 = vxpose.xlu1.b32.cont [9/16] %v1982_v4, 128  ;;  %v1986_v50 = vadd.f32 %v1985_v40, %v4709_v34 }
 0x635   : > { %v2124_v49 = vmul.f32 0.088388346, %v1984_v44 }
 0x637   : > { %v2899_v53 = vpack.c.bf16 %v2124_v49, %v2123_v8 }
 0x638   : > { %2220 = vxpose.xlu1.b32.cont [10/16] %v1986_v50, 128  ;;  %v1989_v54 = vpop.f32.mrb[20].mxu0  ;;  %v3279_v55 = vpop.f32.mrb[8].mxu1 }
 0x639   : > { %2999 = vst [vmem:[%s4484_s12 + $0x20] sm:$0xff] %v2899_v53   ;;  %v1990_v21 = vadd.f32 %v1989_v54, %v4707_v59  ;;  %v1991_v56 = vpop.f32.mrb[21].mxu0  ;;  %v2084_v58 = vpop.f32.mrb[9].mxu1  ;;  %v2093_v62 = vadd.f32 %v3279_v55, %v4715_v48 }
 0x63a   : > { %v1992_v26 = vadd.f32 %v1991_v56, %v4709_v34  ;;  %v1993_v60 = vpop.f32.mrb[22].mxu0  ;;  %v3280_v61 = vpop.f32.mrb[10].mxu1  ;;  %v2085_v1 = vadd.f32 %v2084_v58, %v4715_v48 }
 0x63b   : > { %v1994_v47 = vadd.f32 %v1993_v60, %v4707_v59  ;;  %v2096_v63 = vadd.f32 %v3280_v61, %v4715_v48  ;;  %v1995_v0 = vpop.f32.mrb[23].mxu0  ;;  %v2087_v45 = vpop.f32.mrb[11].mxu1  ;;  %v2125_v3 = vmul.f32 0.088388346, %v1990_v21 }
 0x63c   : > { %v2088_v2 = vadd.f32 %v2087_v45, %v4715_v48  ;;  %2221 = vxpose.xlu1.b32.cont [11/16] %v1992_v26, 128  ;;  %v1996_v6 = vadd.f32 %v1995_v0, %v4709_v34 }
 0x63d   : > { %v2126_v46 = vmul.f32 0.088388346, %v1994_v47  ;;  %v2984_v5 = vpack.c.bf16 %v2096_v63, %v2093_v62 }
 0x63e   : > { %v2979_v7 = vpack.c.bf16 %v2088_v2, %v2085_v1 }
 0x63f   : > { %v2904_v9 = vpack.c.bf16 %v2126_v46, %v2125_v3  ;;  %3014 = vst [vmem:[%s4488_s0 + $0x28] sm:$0xff] %v2984_v5  }
 0x640   : > { %3013 = vst [vmem:[%s4488_s0 + $0x20] sm:$0xff] %v2979_v7   ;;  %2222 = vxpose.xlu1.b32.cont [12/16] %v1996_v6, 128  ;;  %v1999_v10 = vpop.f32.mrb[24].mxu0 }
 0x641   : > { %3000 = vst [vmem:[%s4484_s12 + $0x28] sm:$0xff] %v2904_v9   ;;  %v2000_v11 = vadd.f32 %v1999_v10, %v4707_v59  ;;  %v2001_v12 = vpop.f32.mrb[25].mxu0 }
 0x642   : > { %v2002_v13 = vadd.f32 %v2001_v12, %v4709_v34  ;;  %v2003_v14 = vpop.f32.mrb[26].mxu0 }
 0x643   : > { %v2004_v15 = vadd.f32 %v2003_v14, %v4707_v59  ;;  %v2005_v16 = vpop.f32.mrb[27].mxu0  ;;  %v2127_v51 = vmul.f32 0.088388346, %v2000_v11 }
 0x644   : > { %2223 = vxpose.xlu1.b32.cont [13/16] %v2002_v13, 128  ;;  %v2006_v18 = vadd.f32 %v2005_v16, %v4709_v34 }
 0x645   : > { %v2128_v17 = vmul.f32 0.088388346, %v2004_v15 }
 0x647   : > { %v2909_v19 = vpack.c.bf16 %v2128_v17, %v2127_v51 }
 0x648   : > { %2224 = vxpose.xlu1.b32.cont [14/16] %v2006_v18, 128  ;;  %v2009_v52 = vpop.f32.mrb[28].mxu0  ;;  %v3283_v20 = vpop.f32.mrb[12].mxu1 }
 0x649   : > { %3001 = vst [vmem:[%s4484_s12 + $0x30] sm:$0xff] %v2909_v19   ;;  %v2010_v22 = vadd.f32 %v2009_v52, %v4707_v59  ;;  %v2011_v23 = vpop.f32.mrb[29].mxu0  ;;  %v2100_v24 = vpop.f32.mrb[13].mxu1  ;;  %v2109_v29 = vadd.f32 %v3283_v20, %v4715_v48 }
 0x64a   : > { %v2012_v25 = vadd.f32 %v2011_v23, %v4709_v34  ;;  %v2013_v27 = vpop.f32.mrb[30].mxu0  ;;  %v3284_v28 = vpop.f32.mrb[14].mxu1  ;;  %v2101_v33 = vadd.f32 %v2100_v24, %v4715_v48 }
 0x64b   : > { %v2014_v30 = vadd.f32 %v2013_v27, %v4707_v59  ;;  %v2112_v57 = vadd.f32 %v3284_v28, %v4715_v48  ;;  %v2015_v31 = vpop.f32.mrb[31].mxu0  ;;  %v2103_v32 = vpop.f32.mrb[15].mxu1  ;;  %v2129_v36 = vmul.f32 0.088388346, %v2010_v22 }
 0x64c   : > { %v2104_v35 = vadd.f32 %v2103_v32, %v4715_v48  ;;  %2225 = vxpose.xlu1.b32.cont [15/16] %v2012_v25, 128  ;;  %v2016_v38 = vadd.f32 %v2015_v31, %v4709_v34 }
 0x64d   : > { %v2130_v37 = vmul.f32 0.088388346, %v2014_v30  ;;  %v2994_v41 = vpack.c.bf16 %v2112_v57, %v2109_v29 }
 0x64e   : > { %v2989_v42 = vpack.c.bf16 %v2104_v35, %v2101_v33 }
 0x64f   : > { %v2914_v39 = vpack.c.bf16 %v2130_v37, %v2129_v36  ;;  %3016 = vst [vmem:[%s4488_s0 + $0x38] sm:$0xff] %v2994_v41  }
 0x650   : > { %3015 = vst [vmem:[%s4488_s0 + $0x30] sm:$0xff] %v2989_v42   ;;  %2226 = vxpose.xlu1.b32.end [16/16] %v2016_v38, 128 }
 0x651   : > { %3002 = vst [vmem:[%s4484_s12 + $0x38] sm:$0xff] %v2914_v39  }
 0x694   : > { %v2227_v59 = vpop.trf.xlu1 }
 0x698   : > { %v2228_v4 = vpop.trf.xlu1 }
 0x699   : > { %v2919_v43 = vpack.c.bf16 %v2228_v4, %v2227_v59 }
 0x69b   : > { %2920 = vst [vmem:[%s4486_s6] sm:$0xff] %v2919_v43  }
 0x69c   : > { %v2229_v48 = vpop.trf.xlu1 }
 0x6a0   : > { %v2230_v44 = vpop.trf.xlu1 }
 0x6a1   : > { %v2924_v40 = vpack.c.bf16 %v2230_v44, %v2229_v48 }
 0x6a3   : > { %3003 = vst [vmem:[%s4486_s6 + $0x8] sm:$0xff] %v2924_v40  }
 0x6a4   : > { %v2231_v8 = vpop.trf.xlu1 }
 0x6a8   : > { %v2232_v34 = vpop.trf.xlu1 }
 0x6a9   : > { %v2929_v49 = vpack.c.bf16 %v2232_v34, %v2231_v8 }
 0x6ab   : > { %3004 = vst [vmem:[%s4486_s6 + $0x10] sm:$0xff] %v2929_v49  }
 0x6ac   : > { %v2233_v50 = vpop.trf.xlu1 }
 0x6b0   : > { %v2234_v53 = vpop.trf.xlu1 }
 0x6b1   : > { %v2934_v54 = vpack.c.bf16 %v2234_v53, %v2233_v50 }
 0x6b3   : > { %3005 = vst [vmem:[%s4486_s6 + $0x18] sm:$0xff] %v2934_v54  }
 0x6b4   : > { %v2235_v55 = vpop.trf.xlu1 }
 0x6b8   : > { %v2236_v21 = vpop.trf.xlu1 }
 0x6b9   : > { %v2939_v56 = vpack.c.bf16 %v2236_v21, %v2235_v55 }
 0x6bb   : > { %3006 = vst [vmem:[%s4486_s6 + $0x20] sm:$0xff] %v2939_v56  }
 0x6bc   : > { %v2237_v58 = vpop.trf.xlu1 }
 0x6c0   : > { %v2238_v26 = vpop.trf.xlu1 }
 0x6c1   : > { %v2944_v60 = vpack.c.bf16 %v2238_v26, %v2237_v58 }
 0x6c3   : > { %3007 = vst [vmem:[%s4486_s6 + $0x28] sm:$0xff] %v2944_v60  }
 0x6c4   : > { %v2239_v61 = vpop.trf.xlu1 }
 0x6c8   : > { %v2240_v62 = vpop.trf.xlu1 }
 0x6c9   : > { %v2949_v47 = vpack.c.bf16 %v2240_v62, %v2239_v61 }
 0x6cb   : > { %3008 = vst [vmem:[%s4486_s6 + $0x30] sm:$0xff] %v2949_v47  }
 0x6cc   : > { %v2241_v63 = vpop.trf.xlu1 }
 0x6d0   : > { %v2242_v0 = vpop.trf.xlu1 }
 0x6d1   : > { %v2954_v45 = vpack.c.bf16 %v2242_v0, %v2241_v63 }
 0x6d3   : > { %3009 = vst [vmem:[%s4486_s6 + $0x38] sm:$0xff] %v2954_v45  }
 0x6d4 PF: > { %s5050_s9 = sld [smem:[#allocation32_spill]]  ;;  %s5051_s23 = sld [smem:[#allocation31_spill]] }
 0x6d5   : > { %s5052_s30 = sld [smem:[#allocation33_spill]]  ;;  %s2408_s5 = sand.u32 1, %s4176_s22  }
 0x6d6   : > { %s2448_s7 = sshll.u32 %s4486_s6, 4  ;;  %s5053_s28 = sld [smem:[#allocation50_spill]]  ;;  %s4795_s7 = int_to_ptr.vmem [resolvable:$true] %s2448_s7 }
 0x6d7   : > { %s4802_s2 = scalar_lea.sflag [#allocation20], %s2408_s5  ;;  %s3828_s22 = scalar_lea.vmem %s4795_s7, 1024 }
 0x6d8   : > { %p3829_p7 = scmp.ne.s32.totalorder %s4795_s7, %s3828_s22  ;;  %p5054_p10 = scmp.ne.s32.totalorder %s5029_s10, 0 }
 0x6da   : > { %s4788_s15 = smul.u32 %s5051_s23, %s5050_s9  ;;  %p3830_p6 = pnand %p3829_p7, %p5054_p10 }
 0x6db   : > { %s2819_s8 = sshll.u32 %s5052_s30, 5  ;;  %s4054_s9 = smov [#allocation19]  }
 0x6dc   : > { %s2445_s29 = sadd.s32 %s2819_s8, %s4788_s15  ;;  %p3831_p4 = pneg %p3830_p6 }
 0x6dd   : > { %s2822_s1 = sshll.u32 %s2445_s29, 6  ;;  %s3832_s6 = sshll.u32 %s4054_s9, 4  ;;  %s3833_s6 = int_to_ptr.vmem [resolvable:$false] %s3832_s6 }
 0x6de   : > { %s4800_s27 = scalar_lea.hbm %s5053_s28, %s2822_s1  ;;  %s3834_s23 = scalar_lea.vmem %s3833_s6, 2048 }
 0x6df   : > { %p3835_p2 = scmp.lt.s32.totalorder %s4795_s7, %s3833_s6  ;;  %p3836_p8 = scmp.lt.s32.totalorder %s3834_s23, %s3828_s22 }
 0x6e1   : > { %p3837_p13 = por %p3836_p8, %p3835_p2 }
 0x6e3   : > { %p3838_p5 = pnand %p3837_p13, %p3831_p4 }
 0x6e5   : > { %3841 = shalt.err (!%p3838_p5)
}
 0x6e6   : > { %s3842_s5 = scalar_lea.hbm %s4800_s27, 1024  ;;  %s3846_s16 = scalar_lea.hbm %s5053_s28, 4096 }
 0x6e7   : > { %p3843_p1 = scmp.ne.s32.totalorder %s4800_s27, %s3842_s5  ;;  %p3847_p0 = scmp.lt.u32.totalorder %s4800_s27, %s5053_s28 }
 0x6e8   : > { %p3848_p11 = scmp.lt.u32.totalorder %s3846_s16, %s3842_s5  ;;  %p3850_p7 = scmp.lt.u32.totalorder %s3842_s5, %s4800_s27 }
 0x6e9   : > { %p3844_p3 = pnand %p3843_p1, %p5054_p10 }
 0x6ea   : > { %p3849_p12 = por %p3848_p11, %p3847_p0 }
 0x6eb   : > { %p3845_p9 = pneg %p3844_p3 }
 0x6ec   : > { %p3851_p6 = por %p3850_p7, %p3849_p12 }
 0x6ee   : > { %p3852_p4 = pnand %p3851_p6, %p3845_p9 }
 0x6f0   : > { %3855 = shalt.err (!%p3852_p4)
}
 0x6f1   : > { %s4055_s22 = smov 64   ;;  %s5055_s6 = sld [smem:[#allocation29_spill]] }
 0x6f2   : > { %s4056_s23 = smov 128   ;;  %s4057_s29 = smov 4  }
 0x6f3   : > { %3392 = dma.vmem_to_hbm [thread:$0]  (%p5054_p10), %s4795_s7, 1024, %s4800_s27, %s4802_s2, %s4055_s22, %s4056_s23, %s4057_s29  }
 0x6f4   : > { %s2818_s5 = sshll.u32 %s4788_s15, 4  ;;  %s2430_s16 = sshll.u32 %s4484_s12, 4  ;;  %s4832_s16 = int_to_ptr.vmem [resolvable:$true] %s2430_s16 }
 0x6f5   : > { %s2427_s1 = sadd.s32 %s2819_s8, %s2818_s5  ;;  %s5056_s24 = sld [smem:[#allocation49_spill]] }
 0x6f6   : > { %s2820_s25 = sshll.u32 %s2427_s1, 6  ;;  %s5057_s18 = sld [smem:[#allocation51_spill]] }
 0x6f7   : > { %s5059_s27 = sand.u32 1, %s5055_s6   ;;  %s3856_s12 = scalar_lea.vmem %s4832_s16, 1024 }
 0x6f8   : > { %s4846_s30 = scalar_lea.sflag [#allocation8], %s5059_s27  ;;  %p3857_p2 = scmp.ne.s32.totalorder %s4832_s16, %s3856_s12 }
 0x6f9   : > { %s4058_s15 = smov [#allocation18]  }
 0x6fa   : > { %p3858_p8 = pnand %p3857_p2, %p5054_p10  ;;  %s3860_s8 = sshll.u32 %s4058_s15, 4  ;;  %s3861_s8 = int_to_ptr.vmem [resolvable:$false] %s3860_s8 }
 0x6fb   : > { %s4837_s26 = scalar_lea.hbm %s5056_s24, %s2820_s25  ;;  %s3862_s7 = scalar_lea.vmem %s3861_s8, 2048 }
 0x6fc   : > { %s5058_s3 = smov %s5057_s18  ;;  %s4842_s14 = scalar_lea.hbm %s5057_s18, %s2820_s25 }
 0x6fd   : > { %p3859_p13 = pneg %p3858_p8  ;;  %p3863_p5 = scmp.lt.s32.totalorder %s4832_s16, %s3861_s8 }
 0x6fe   : > { %p3864_p1 = scmp.lt.s32.totalorder %s3862_s7, %s3856_s12 }
 0x700   : > { %p3865_p3 = por %p3864_p1, %p3863_p5 }
 0x702   : > { %p3866_p9 = pnand %p3865_p3, %p3859_p13 }
 0x704   : > { %3869 = shalt.err (!%p3866_p9)
}
 0x705   : > { %s3870_s18 = scalar_lea.hbm %s4837_s26, 1024  ;;  %s3874_s28 = scalar_lea.hbm %s5056_s24, 4096 }
 0x706   : > { %p3871_p0 = scmp.ne.s32.totalorder %s4837_s26, %s3870_s18  ;;  %p3875_p7 = scmp.lt.u32.totalorder %s4837_s26, %s5056_s24 }
 0x707   : > { %p3876_p6 = scmp.lt.u32.totalorder %s3874_s28, %s3870_s18  ;;  %p3878_p2 = scmp.lt.u32.totalorder %s3870_s18, %s4837_s26 }
 0x708   : > { %p3872_p11 = pnand %p3871_p0, %p5054_p10 }
 0x709   : > { %p3877_p4 = por %p3876_p6, %p3875_p7 }
 0x70a   : > { %p3873_p12 = pneg %p3872_p11 }
 0x70b   : > { %p3879_p8 = por %p3878_p2, %p3877_p4 }
 0x70d   : > { %p3880_p13 = pnand %p3879_p8, %p3873_p12 }
 0x70f   : > { %3883 = shalt.err (!%p3880_p13)
}
 0x710   : > { %3391 = dma.vmem_to_hbm [thread:$0]  (%p5054_p10), %s4832_s16, 1024, %s4837_s26, %s4846_s30, %s4055_s22, %s4055_s22, %s4057_s29  }
 0x711   : > { %s2467_s5 = sshll.u32 %s4488_s0, 4  ;;  %s4059_s25 = smov [#allocation21]   ;;  %s4874_s5 = int_to_ptr.vmem [resolvable:$true] %s2467_s5 }
 0x712   : > { %s3884_s1 = scalar_lea.vmem %s4874_s5, 1024  ;;  %s3888_s9 = sshll.u32 %s4059_s25, 4  ;;  %s3889_s9 = int_to_ptr.vmem [resolvable:$false] %s3888_s9 }
 0x713   : > { %p3885_p5 = scmp.ne.s32.totalorder %s4874_s5, %s3884_s1  ;;  %s3890_s27 = scalar_lea.vmem %s3889_s9, 2048 }
 0x714   : > { %p3891_p9 = scmp.lt.s32.totalorder %s4874_s5, %s3889_s9  ;;  %p3892_p0 = scmp.lt.s32.totalorder %s3890_s27, %s3884_s1 }
 0x715   : > { %p3886_p1 = pnand %p3885_p5, %p5054_p10 }
 0x716   : > { %p3893_p11 = por %p3892_p0, %p3891_p9 }
 0x717   : > { %p3887_p3 = pneg %p3886_p1 }
 0x719   : > { %p3894_p12 = pnand %p3893_p11, %p3887_p3 }
 0x71b   : > { %3897 = shalt.err (!%p3894_p12)
}
 0x71c   : > { %s3898_s26 = scalar_lea.hbm %s4842_s14, 1024  ;;  %s3902_s30 = scalar_lea.hbm %s5058_s3, 4096 }
 0x71d   : > { %p3899_p7 = scmp.ne.s32.totalorder %s4842_s14, %s3898_s26  ;;  %p3903_p2 = scmp.lt.u32.totalorder %s4842_s14, %s5058_s3 }
 0x71e   : > { %p3904_p8 = scmp.lt.u32.totalorder %s3902_s30, %s3898_s26  ;;  %p3906_p5 = scmp.lt.u32.totalorder %s3898_s26, %s4842_s14 }
 0x71f   : > { %p3900_p6 = pnand %p3899_p7, %p5054_p10 }
 0x720   : > { %p3905_p13 = por %p3904_p8, %p3903_p2 }
 0x721   : > { %p3901_p4 = pneg %p3900_p6 }
 0x722   : > { %p3907_p1 = por %p3906_p5, %p3905_p13 }
 0x724   : > { %p3908_p3 = pnand %p3907_p1, %p3901_p4 }
 0x726   : > { %3911 = shalt.err (!%p3908_p3)
}
 0x727   : > { %3393 = dma.vmem_to_hbm [thread:$0]  (%p5054_p10), %s4874_s5, 1024, %s4842_s14, %s4802_s2, %s4055_s22, %s4055_s22, %s4057_s29  }
 0x728 PF: > { %s5060_s8 = sld [smem:[#allocation28_spill]]  ;;  %p3443_p9 = scmp.ge.s32.totalorder %s4038_s21, 2 }
 0x729   : > { %p5061_p0 = scmp.ne.s32.totalorder %s5030_s17, 0 }
 0x72b   : > { %p3421_p11 = pnand %p3443_p9, %p5061_p0 }
 0x72e   : > { %s2482_s7 = sand.u32 1, %s5060_s8  }
 0x72f   : > { %s2483_s18 = scalar_lea.sflag [#allocation8], %s2482_s7 }
 0x730   : > { %3981 = dma.done.wait (!%p3421_p11), %s2483_s18, 1024  }
 0x731   : > { %3983 = vsyncadd (!%p3421_p11), %s2483_s18, 4294966272  ;;  %s5062_s10 = sadd.s32 4294967294, %s4038_s21  }
 0x732   : > { %s2491_s19 = sand.u32 1, %s5062_s10  }
 0x733   : > { %s2492_s20 = scalar_lea.sflag [#allocation20], %s2491_s19 }
 0x734   : > { %3985 = dma.done.wait (!%p3421_p11), %s2492_s20, 2048  }
 0x735   : > { %3987 = vsyncadd (!%p3421_p11), %s2492_s20, 4294965248  ;;  %s32_s21 = sadd.s32 1, %s4038_s21   ;;  %s5064_s30 = sld [smem:[#allocation29_spill]] }
 0x736   : > { %p4908_p10 = scmp.ge.s32.totalorder %s32_s21, 10   ;;  %s5065_s17 = sld [smem:[#allocation30_spill]] }
 0x737   : > { %s5066_s2 = sld [smem:[#allocation41_spill]]  ;;  %s5067_s15 = sld [smem:[#allocation34_spill]] }
 0x738   : > { %s5068_s16 = sld [smem:[#allocation35_spill]]  ;;  %s5069_s22 = sld [smem:[#allocation36_spill]] }
 0x739   : > { %s5070_s18 = sld [smem:[#allocation38_spill]]  ;;  %s5071_s19 = sld [smem:[#allocation39_spill]] }
 0x73a   : > { %s5072_s20 = sld [smem:[#allocation40_spill]]  ;;  %s5074_s10 = smov %s3998_s11 }
 0x73b   : > { %s5075_s11 = smov %s4408_s4  ;;  %s5076_s12 = smov %s4006_s13 }
 0x73c   : > { %s5077_s13 = smov %s5065_s17  ;;  %31 = sbr.rel (!%p4908_p10) target bundleno = 26 (0x1a), region = 165 }
 0x73d   : > { %s5078_s14 = smov %s5066_s2 }
 0x73e   : > { %s5079_s17 = smov %s5069_s22 }
 0x743   :  { %2506 = vsyncpa [#allocation7], 1 }
 0x744   :  { %2508 = vsyncpa [#allocation7 + $0x1], 1 }
 0x745   :  { %2509 = vsyncpa [#allocation10], 1 }
 0x746   :  { %2510 = vsyncpa [#allocation13], 1 }
 0x747   :  { %2511 = vsyncpa [#allocation16], 1 }
 0x748   :  { %2512 = vsyncpa [#allocation8], 1 }
 0x749   :  { %2514 = vsyncpa [#allocation8 + $0x1], 1 }
 0x74a   :  { %2515 = vsyncpa [#allocation20], 1 }
 0x74b   :  { %2517 = vsyncpa [#allocation20 + $0x1], 1 }

</bundles_post_ra>
